<compile_context>
chip_gen: v7x
topology: tpu7x:2x2x1
jax: 0.10.0
libtpu: 0.0.40
codegen_flags: <defaults>
</compile_context>

<pallas_src>
import functools
import math

import jax
import jax.numpy as jnp
from jax.experimental import pallas as pl
from jax.experimental.pallas import tpu as pltpu


# ---------------------------------------------------------------------------
# small helpers
# ---------------------------------------------------------------------------
def _round_up(v, m):
    return ((v + m - 1) // m) * m


def _pick_tile_m(m, unit, max_tile=512):
    """Lane-tile width: a multiple of `unit` (itself a multiple of 128), <= max_tile,
    and small enough to give >=4 grid steps when m allows (2 steps per v7x TC)."""
    max_tile = max(unit, (max_tile // unit) * unit)
    t = (m // (4 * unit)) * unit
    return int(min(max_tile, max(unit, t)))


def _vmem_limit_bytes(per_step_bytes):
    try:
        cap = int(pltpu.get_tpu_info().vmem_capacity_bytes)
    except Exception:  # conservative fallback if the query is unavailable
        cap = 64 << 20
    want = 4 * int(per_step_bytes) + (4 << 20)
    return int(max(8 << 20, min(want, 48 << 20, (cap * 3) // 4)))


# ---------------------------------------------------------------------------
# Pallas kernels
# ---------------------------------------------------------------------------
def _matmul_bias_kernel(x_ref, w_ref, b_ref, o_ref):
    """o[Cout, TM] = W[Cout, Cin] @ x[Cin, TM] + b (f32 accumulate, lane-dense store)."""
    x = x_ref[...].astype(jnp.float32)
    w = w_ref[...].astype(jnp.float32)
    acc = jnp.dot(w, x, preferred_element_type=jnp.float32) + b_ref[...]
    o_ref[...] = acc.astype(o_ref.dtype)


def _fused_conv3x3_kernel(*refs, n_src, taps, negative_slope):
    """Fused [replicate-padded 3x3 conv over concat(sources)] + bias + LeakyReLU.

    refs = (x_tile_0, x_halo_0, ..., x_tile_{n-1}, x_halo_{n-1},
            w_0, ..., w_{n-1}, bias, out)
      x_tile_s : [C_s, TM]      bf16  current lane tile of the flat padded activation
      x_halo_s : [C_s, WIN]     bf16  next WIN lanes (halo for the shifted taps)
      w_s      : [9, Cout, C_s] f32   tap-major weights (t = di*3 + dj)
      bias     : [Cout, 1]      f32
      out      : [Cout, TM]
    """
    x_refs = refs[: 2 * n_src]
    w_refs = refs[2 * n_src: 3 * n_src]
    b_ref = refs[3 * n_src]
    o_ref = refs[3 * n_src + 1]
    cout, tm = o_ref.shape

    acc = jnp.zeros((cout, tm), jnp.float32)
    for s in range(n_src):
        xa = x_refs[2 * s][...].astype(jnp.float32)
        xb = x_refs[2 * s + 1][...].astype(jnp.float32)
        win = jnp.concatenate([xa, xb], axis=1)          # [C_s, TM + WIN]
        for t, off in enumerate(taps):                   # 9 shifted matmuls per source
            xs = win[:, off:off + tm]                    # static lane-offset slice
            acc = acc + jnp.dot(w_refs[s][t], xs,
                                preferred_element_type=jnp.float32)
    acc = acc + b_ref[...]
    if negative_slope is not None:
        acc = jnp.maximum(acc, acc * negative_slope)     # LeakyReLU (v5e-friendly)
    o_ref[...] = acc.astype(o_ref.dtype)                 # lane-dense, bf16 or f32


# ---------------------------------------------------------------------------
# pallas_call builders
# ---------------------------------------------------------------------------
def _matmul_bias(x_flat, w_mat, bias_col, *, out_dtype, tile_m_max=512):
    """out[Cout, M] = W @ x + b, tiled over the flattened-pixel (lane) axis."""
    cin, m = x_flat.shape
    cout = w_mat.shape[0]
    tm = _pick_tile_m(m, 128, tile_m_max)
    m_grid = _round_up(m, tm)
    xp = jnp.pad(x_flat, ((0, 0), (0, m_grid - m)))

    per_step = (2 * cin * tm * x_flat.dtype.itemsize + cin * tm * 4
                + 2 * cout * tm * jnp.dtype(out_dtype).itemsize
                + w_mat.size * 4 + cout * 4)

    out = pl.pallas_call(
        _matmul_bias_kernel,
        out_shape=jax.ShapeDtypeStruct((cout, m_grid), out_dtype),
        grid=(m_grid // tm,),
        in_specs=[
            pl.BlockSpec((cin, tm), lambda i: (0, i)),
            pl.BlockSpec((cout, cin), lambda i: (0, 0)),
            pl.BlockSpec((cout, 1), lambda i: (0, 0)),
        ],
        out_specs=pl.BlockSpec((cout, tm), lambda i: (0, i)),
        compiler_params=pltpu.CompilerParams(
            dimension_semantics=("parallel",),
            vmem_limit_bytes=_vmem_limit_bytes(per_step)),
    )(xp, w_mat, bias_col)
    return out[:, :m]


def _fused_conv3x3(sources, weights, bias_col, *, wp, negative_slope, out_dtype,
                   tile_m_max=512):
    """3x3 conv on the replicate-padded grid, computed as 9 shifted matmuls.

    sources : list of flat padded activations [C_s, B*Hp*Wp] (bf16), flattened in
              (b, row, col) order; taken together they form the concatenated input.
    weights : list of [9, Cout, C_s] f32, tap index t = di*3 + dj.
    Returns : [Cout, B*Hp*Wp] in out_dtype; padded-grid positions with row >= Hp-2 or
              col >= Wp-2 are garbage and must be sliced away by the caller.
    """
    m_cmp = sources[0].shape[1]
    win = _round_up(2 * wp + 2, 128)                 # halo needed by the (di, dj) taps
    tm = _pick_tile_m(m_cmp, win, tile_m_max)
    m_grid = _round_up(m_cmp, tm)
    n_steps = m_grid // tm
    cout = weights[0].shape[1]
    taps = tuple(di * wp + dj for di in range(3) for dj in range(3))
    ratio = tm // win

    # Zero-pad the flat activation so the last tile's halo block stays in-bounds.
    padded = [jnp.pad(s, ((0, 0), (0, m_grid + win - m_cmp))) for s in sources]

    in_specs, operands, per_step = [], [], 0
    for src in padded:
        c_s = src.shape[0]
        in_specs.append(pl.BlockSpec((c_s, tm), lambda i: (0, i)))
        in_specs.append(pl.BlockSpec((c_s, win),
                                     lambda i, _r=ratio: (0, (i + 1) * _r)))
        operands += [src, src]
        per_step += c_s * (tm + win) * (2 * src.dtype.itemsize + 4)
    for wmat in weights:
        in_specs.append(pl.BlockSpec(wmat.shape, lambda i: (0, 0, 0)))
        operands.append(wmat)
        per_step += wmat.size * 4
    in_specs.append(pl.BlockSpec((cout, 1), lambda i: (0, 0)))
    operands.append(bias_col)
    per_step += 2 * cout * tm * jnp.dtype(out_dtype).itemsize + cout * tm * 4

    kernel = functools.partial(_fused_conv3x3_kernel, n_src=len(sources),
                               taps=taps, negative_slope=negative_slope)
    out = pl.pallas_call(
        kernel,
        out_shape=jax.ShapeDtypeStruct((cout, m_grid), out_dtype),
        grid=(n_steps,),
        in_specs=in_specs,
        out_specs=pl.BlockSpec((cout, tm), lambda i: (0, i)),
        compiler_params=pltpu.CompilerParams(
            dimension_semantics=("parallel",),
            vmem_limit_bytes=_vmem_limit_bytes(per_step)),
    )(*operands)
    return out[:, :m_cmp]


# ---------------------------------------------------------------------------
# parameter packing (done once) + jit-able forward
# ---------------------------------------------------------------------------
def prepare_params(params):
    """Pack weights once into kernel-friendly layouts (weights stay f32: tiny)."""
    c_up = params["up_w"].shape[1]                      # ConvTranspose2d out_channels
    up_wmat = (jnp.transpose(params["up_w"], (1, 2, 3, 0))
               .reshape(c_up * 4, params["up_w"].shape[0]).astype(jnp.float32))
    up_bias = jnp.repeat(params["up_b"].astype(jnp.float32), 4).reshape(-1, 1)

    def tapmajor(w):                                    # [Cout, C, 3, 3] -> [9, Cout, C]
        return (jnp.transpose(w, (2, 3, 0, 1))
                .reshape(9, w.shape[0], w.shape[1]).astype(jnp.float32))

    w1 = params["w1"]
    return dict(
        up_w=up_wmat, up_b=up_bias,
        w1_up=tapmajor(w1[:, :c_up]), w1_skip=tapmajor(w1[:, c_up:]),
        b1=params["b1"].astype(jnp.float32).reshape(-1, 1),
        w2=tapmajor(params["w2"]),
        b2=params["b2"].astype(jnp.float32).reshape(-1, 1),
    )


def up_forward(x1, x2, prep, *, negative_slope=0.1, act_dtype=jnp.bfloat16):
    """Forward of `Up` (eval mode): ConvTranspose2d(2,2) -> concat(skip) ->
    [replicate-pad -> 3x3 conv -> LeakyReLU] x 2.  Returns NCHW float32."""
    b, cin, h, w = x1.shape
    c_up = prep["up_b"].shape[0] // 4
    cout = prep["b1"].shape[0]

    # ---- up: 2x2 / stride-2 transposed conv == a single matmul over flat pixels ----
    x1f = jnp.transpose(x1.astype(act_dtype), (1, 0, 2, 3)).reshape(cin, b * h * w)
    u = _matmul_bias(x1f, prep["up_w"], prep["up_b"], out_dtype=act_dtype)
    u = u.reshape(c_up, 2, 2, b, h, w)
    u = jnp.transpose(u, (0, 3, 4, 1, 5, 2)).reshape(c_up, b, 2 * h, 2 * w)
    # (dropout1 is identity in eval mode)

    skip = jnp.transpose(x2.astype(act_dtype), (1, 0, 2, 3))      # [Cskip, B, 2H, 2W]

    def flat_pad(t):   # replicate-pad + flatten to the kernel's (b, row, col) lane order
        tp = jnp.pad(t, ((0, 0), (0, 0), (1, 1), (1, 1)), mode="edge")
        return tp.reshape(tp.shape[0], -1), tp.shape[2], tp.shape[3]

    # ---- conv1: concat(up, skip) + pad + 3x3 conv + bias + LeakyReLU (fused) ----
    up_flat, hp, wp = flat_pad(u)
    skip_flat, _, _ = flat_pad(skip)
    y = _fused_conv3x3([up_flat, skip_flat], [prep["w1_up"], prep["w1_skip"]],
                       prep["b1"], wp=wp, negative_slope=negative_slope,
                       out_dtype=act_dtype)
    y = y.reshape(cout, b, hp, wp)[:, :, :hp - 2, :wp - 2]
    # (dropout inside conv1's Sequential is identity in eval mode)

    # ---- conv2: pad + 3x3 conv + bias + LeakyReLU (fused), f32 final output ----
    y_flat, hp2, wp2 = flat_pad(y)
    z = _fused_conv3x3([y_flat], [prep["w2"]], prep["b2"], wp=wp2,
                       negative_slope=negative_slope, out_dtype=jnp.float32)
    z = z.reshape(cout, b, hp2, wp2)[:, :, :hp2 - 2, :wp2 - 2]
    return jnp.transpose(z, (1, 0, 2, 3))


# ---------------------------------------------------------------------------
# Pure-JAX reference.  act_dtype=bf16 mirrors the kernel's activation rounding;
# act_dtype=f32 is the "true" full-precision reference (loose structural check).
# ---------------------------------------------------------------------------
def _reference_up(x1, x2, params, *, negative_slope, act_dtype=jnp.float32):
    hi = jax.lax.Precision.HIGHEST

    def q(t):
        return t.astype(act_dtype).astype(jnp.float32)

    up = jnp.einsum("bcij,cokl->boikjl", q(x1), params["up_w"], precision=hi)
    b, _, h, w = x1.shape
    cup = params["up_w"].shape[1]
    up = up.reshape(b, cup, 2 * h, 2 * w) + params["up_b"].reshape(1, -1, 1, 1)
    x = jnp.concatenate([q(up), q(x2)], axis=1)

    def conv3(xin, wgt, bias):
        xp = jnp.pad(xin, ((0, 0), (0, 0), (1, 1), (1, 1)), mode="edge")
        out = jax.lax.conv_general_dilated(
            xp, wgt, window_strides=(1, 1), padding="VALID",
            dimension_numbers=("NCHW", "OIHW", "NCHW"),
            preferred_element_type=jnp.float32, precision=hi)
        out = out + bias.reshape(1, -1, 1, 1)
        return jnp.maximum(out, out * negative_slope)

    x = conv3(x, params["w1"], params["b1"])
    x = conv3(q(x), params["w2"], params["b2"])
    return x


if __name__ == "__main__":
    # Up(in_channel=4, skip_chanel=4, out_channel=8, dropout=0.1, lr=0.1), eval mode.
    B, Cin, Cskip, Cout, H, W = 2, 4, 4, 8, 16, 16
    lr_slope = 0.1

    key = jax.random.PRNGKey(0)
    k1, k2, k3, k4, k5, k6 = jax.random.split(key, 6)

    x1 = jax.random.normal(k1, (B, Cin, H, W), dtype=jnp.float32)
    x2 = jax.random.normal(k2, (B, Cskip, 2 * H, 2 * W), dtype=jnp.float32)

    # ConvTranspose2d(Cin, Cin, 2, 2): PyTorch weight layout [Cin, Cout, 2, 2] + bias.
    up_w = 0.5 * jax.random.normal(k3, (Cin, Cin, 2, 2), dtype=jnp.float32)
    up_b = 0.1 * jax.random.normal(k4, (Cin,), dtype=jnp.float32)
    # conv1 / conv2: kaiming_normal weights, zero bias (matches layer_init).
    fan1 = (Cin + Cskip) * 9
    w1 = math.sqrt(2.0 / fan1) * jax.random.normal(
        k5, (Cout, Cin + Cskip, 3, 3), dtype=jnp.float32)
    b1 = jnp.zeros((Cout,), jnp.float32)
    fan2 = Cout * 9
    w2 = math.sqrt(2.0 / fan2) * jax.random.normal(
        k6, (Cout, Cout, 3, 3), dtype=jnp.float32)
    b2 = jnp.zeros((Cout,), jnp.float32)

    params = dict(up_w=up_w, up_b=up_b, w1=w1, b1=b1, w2=w2, b2=b2)
    prep = prepare_params(params)                       # packed once, reused per call

    fwd = jax.jit(functools.partial(up_forward, negative_slope=lr_slope))
    out = fwd(x1, x2, prep)
    jax.block_until_ready(out)
    assert out.shape == (B, Cout, 2 * H, 2 * W), out.shape

    ref_bf16 = _reference_up(x1, x2, params, negative_slope=lr_slope,
                             act_dtype=jnp.bfloat16)
    ref_f32 = _reference_up(x1, x2, params, negative_slope=lr_slope,
                            act_dtype=jnp.float32)
    err_matched = float(jnp.max(jnp.abs(out - ref_bf16)))   # same activation rounding
    err_true = float(jnp.max(jnp.abs(out - ref_f32)))       # vs. true f32 math
    assert err_matched < 1e-2, err_matched
    assert err_true < 0.25, err_true

    print("KERNEL_OK")
</pallas_src>

<mosaic_0001>
module attributes {stable_mosaic.version = 11 : i64} {
  func.func @_matmul_bias_kernel(%arg0: i32, %arg1: memref<4x128xbf16, #tpu.memory_space<vmem>>, %arg2: memref<16x4xf32, #tpu.memory_space<vmem>>, %arg3: memref<16x1xf32, #tpu.memory_space<vmem>>, %arg4: memref<16x128xbf16, #tpu.memory_space<vmem>>) attributes {dimension_semantics = [#tpu.dimension_semantics<parallel>], iteration_bounds = array<i64: 4>, scalar_prefetch = 0 : i64, scratch_operands = 0 : i64, tpu.core_type = #tpu.core_type<tc>, window_params = [{transform_indices = @transform_0, window_bounds = array<i64: 4, 128>}, {pipeline_mode = #tpu.pipeline_mode<synchronous>, transform_indices = @transform_1, window_bounds = array<i64: 16, 4>}, {pipeline_mode = #tpu.pipeline_mode<synchronous>, transform_indices = @transform_2, window_bounds = array<i64: 16, 1>}, {transform_indices = @transform_3, window_bounds = array<i64: 16, 128>}]} {
    %c0 = arith.constant 0 : index
    %c0_0 = arith.constant 0 : index
    %0 = vector.load %arg1[%c0, %c0_0] : memref<4x128xbf16, #tpu.memory_space<vmem>>, vector<4x128xbf16>
    %1 = arith.extf %0 : vector<4x128xbf16> to vector<4x128xf32>
    %c0_1 = arith.constant 0 : index
    %c0_2 = arith.constant 0 : index
    %2 = vector.load %arg2[%c0_1, %c0_2] : memref<16x4xf32, #tpu.memory_space<vmem>>, vector<16x4xf32>
    %cst = arith.constant dense<0.000000e+00> : vector<16x128xf32>
    %3 = tpu.matmul %2, %1, %cst {dimension_numbers = #tpu.dot_dimension_numbers<[1], [0], [0], [1], [0, 0, 1, 1], [], []>} : vector<16x4xf32>, vector<4x128xf32>, vector<16x128xf32> -> vector<16x128xf32>
    %c0_3 = arith.constant 0 : index
    %c0_4 = arith.constant 0 : index
    %4 = vector.load %arg3[%c0_3, %c0_4] : memref<16x1xf32, #tpu.memory_space<vmem>>, vector<16x1xf32>
    %5 = vector.broadcast %4 : vector<16x1xf32> to vector<16x128xf32>
    %6 = arith.addf %3, %5 : vector<16x128xf32>
    %7 = arith.truncf %6 : vector<16x128xf32> to vector<16x128xbf16>
    %c0_5 = arith.constant 0 : index
    %c0_6 = arith.constant 0 : index
    %8 = vector.load %arg4[%c0_5, %c0_6] : memref<16x128xbf16, #tpu.memory_space<vmem>>, vector<16x128xbf16>
    tpu.vector_store %arg4[%c0_5, %c0_6], %7 {strides = array<i32>} : memref<16x128xbf16, #tpu.memory_space<vmem>>, vector<16x128xbf16>,
    return
  }
  func.func @transform_0(%arg0: i32) -> (i32, i32) {
    %c0_i32 = arith.constant 0 : i32
    %c0_i32_0 = arith.constant 0 : i32
    return %c0_i32, %arg0 : i32, i32
  }
  func.func @transform_1(%arg0: i32) -> (i32, i32) {
    %c0_i32 = arith.constant 0 : i32
    %c0_i32_0 = arith.constant 0 : i32
    %c0_i32_1 = arith.constant 0 : i32
    return %c0_i32, %c0_i32_0 : i32, i32
  }
  func.func @transform_2(%arg0: i32) -> (i32, i32) {
    %c0_i32 = arith.constant 0 : i32
    %c0_i32_0 = arith.constant 0 : i32
    %c0_i32_1 = arith.constant 0 : i32
    return %c0_i32, %c0_i32_0 : i32, i32
  }
  func.func @transform_3(%arg0: i32) -> (i32, i32) {
    %c0_i32 = arith.constant 0 : i32
    %c0_i32_0 = arith.constant 0 : i32
    return %c0_i32, %arg0 : i32, i32
  }
}

module attributes {stable_mosaic.version = 11 : i64} {
  func.func @_fused_conv3x3_kernel(%arg0: i32, %arg1: memref<4x512xbf16, #tpu.memory_space<vmem>>, %arg2: memref<4x128xbf16, #tpu.memory_space<vmem>>, %arg3: memref<4x512xbf16, #tpu.memory_space<vmem>>, %arg4: memref<4x128xbf16, #tpu.memory_space<vmem>>, %arg5: memref<9x8x4xf32, #tpu.memory_space<vmem>>, %arg6: memref<9x8x4xf32, #tpu.memory_space<vmem>>, %arg7: memref<8x1xf32, #tpu.memory_space<vmem>>, %arg8: memref<8x512xbf16, #tpu.memory_space<vmem>>) attributes {dimension_semantics = [#tpu.dimension_semantics<parallel>], iteration_bounds = array<i64: 5>, scalar_prefetch = 0 : i64, scratch_operands = 0 : i64, tpu.core_type = #tpu.core_type<tc>, window_params = [{transform_indices = @transform_0, window_bounds = array<i64: 4, 512>}, {transform_indices = @transform_1, window_bounds = array<i64: 4, 128>}, {transform_indices = @transform_2, window_bounds = array<i64: 4, 512>}, {transform_indices = @transform_3, window_bounds = array<i64: 4, 128>}, {pipeline_mode = #tpu.pipeline_mode<synchronous>, transform_indices = @transform_4, window_bounds = array<i64: 9, 8, 4>}, {pipeline_mode = #tpu.pipeline_mode<synchronous>, transform_indices = @transform_5, window_bounds = array<i64: 9, 8, 4>}, {pipeline_mode = #tpu.pipeline_mode<synchronous>, transform_indices = @transform_6, window_bounds = array<i64: 8, 1>}, {transform_indices = @transform_7, window_bounds = array<i64: 8, 512>}]} {
    %cst = arith.constant 0.000000e+00 : f32
    %0 = vector.broadcast %cst : f32 to vector<8x512xf32>
    %c0 = arith.constant 0 : index
    %c0_0 = arith.constant 0 : index
    %1 = vector.load %arg1[%c0, %c0_0] : memref<4x512xbf16, #tpu.memory_space<vmem>>, vector<4x512xbf16>
    %2 = arith.extf %1 : vector<4x512xbf16> to vector<4x512xf32>
    %c0_1 = arith.constant 0 : index
    %c0_2 = arith.constant 0 : index
    %3 = vector.load %arg2[%c0_1, %c0_2] : memref<4x128xbf16, #tpu.memory_space<vmem>>, vector<4x128xbf16>
    %4 = arith.extf %3 : vector<4x128xbf16> to vector<4x128xf32>
    %5 = tpu.concatenate %2, %4 in 1 : vector<4x512xf32>, vector<4x128xf32> -> vector<4x640xf32>
    %6 = vector.extract_strided_slice %5 {offsets = [0, 0], sizes = [4, 512], strides = [1, 1]} : vector<4x640xf32> to vector<4x512xf32>
    %c0_3 = arith.constant 0 : index
    %c0_4 = arith.constant 0 : index
    %c0_5 = arith.constant 0 : index
    %7 = vector.load %arg5[%c0_3, %c0_4, %c0_5] : memref<9x8x4xf32, #tpu.memory_space<vmem>>, vector<1x8x4xf32>
    %8 = vector.shape_cast %7 : vector<1x8x4xf32> to vector<8x4xf32>
    %cst_6 = arith.constant dense<0.000000e+00> : vector<8x512xf32>
    %9 = tpu.matmul %8, %6, %cst_6 {dimension_numbers = #tpu.dot_dimension_numbers<[1], [0], [0], [1], [0, 0, 1, 1], [], []>} : vector<8x4xf32>, vector<4x512xf32>, vector<8x512xf32> -> vector<8x512xf32>
    %10 = arith.addf %0, %9 : vector<8x512xf32>
    %11 = vector.extract_strided_slice %5 {offsets = [0, 1], sizes = [4, 512], strides = [1, 1]} : vector<4x640xf32> to vector<4x512xf32>
    %c1 = arith.constant 1 : index
    %c0_7 = arith.constant 0 : index
    %c0_8 = arith.constant 0 : index
    %12 = vector.load %arg5[%c1, %c0_7, %c0_8] : memref<9x8x4xf32, #tpu.memory_space<vmem>>, vector<1x8x4xf32>
    %13 = vector.shape_cast %12 : vector<1x8x4xf32> to vector<8x4xf32>
    %cst_9 = arith.constant dense<0.000000e+00> : vector<8x512xf32>
    %14 = tpu.matmul %13, %11, %cst_9 {dimension_numbers = #tpu.dot_dimension_numbers<[1], [0], [0], [1], [0, 0, 1, 1], [], []>} : vector<8x4xf32>, vector<4x512xf32>, vector<8x512xf32> -> vector<8x512xf32>
    %15 = arith.addf %10, %14 : vector<8x512xf32>
    %16 = vector.extract_strided_slice %5 {offsets = [0, 2], sizes = [4, 512], strides = [1, 1]} : vector<4x640xf32> to vector<4x512xf32>
    %c2 = arith.constant 2 : index
    %c0_10 = arith.constant 0 : index
    %c0_11 = arith.constant 0 : index
    %17 = vector.load %arg5[%c2, %c0_10, %c0_11] : memref<9x8x4xf32, #tpu.memory_space<vmem>>, vector<1x8x4xf32>
    %18 = vector.shape_cast %17 : vector<1x8x4xf32> to vector<8x4xf32>
    %cst_12 = arith.constant dense<0.000000e+00> : vector<8x512xf32>
    %19 = tpu.matmul %18, %16, %cst_12 {dimension_numbers = #tpu.dot_dimension_numbers<[1], [0], [0], [1], [0, 0, 1, 1], [], []>} : vector<8x4xf32>, vector<4x512xf32>, vector<8x512xf32> -> vector<8x512xf32>
    %20 = arith.addf %15, %19 : vector<8x512xf32>
    %21 = vector.extract_strided_slice %5 {offsets = [0, 34], sizes = [4, 512], strides = [1, 1]} : vector<4x640xf32> to vector<4x512xf32>
    %c3 = arith.constant 3 : index
    %c0_13 = arith.constant 0 : index
    %c0_14 = arith.constant 0 : index
    %22 = vector.load %arg5[%c3, %c0_13, %c0_14] : memref<9x8x4xf32, #tpu.memory_space<vmem>>, vector<1x8x4xf32>
    %23 = vector.shape_cast %22 : vector<1x8x4xf32> to vector<8x4xf32>
    %cst_15 = arith.constant dense<0.000000e+00> : vector<8x512xf32>
    %24 = tpu.matmul %23, %21, %cst_15 {dimension_numbers = #tpu.dot_dimension_numbers<[1], [0], [0], [1], [0, 0, 1, 1], [], []>} : vector<8x4xf32>, vector<4x512xf32>, vector<8x512xf32> -> vector<8x512xf32>
    %25 = arith.addf %20, %24 : vector<8x512xf32>
    %26 = vector.extract_strided_slice %5 {offsets = [0, 35], sizes = [4, 512], strides = [1, 1]} : vector<4x640xf32> to vector<4x512xf32>
    %c4 = arith.constant 4 : index
    %c0_16 = arith.constant 0 : index
    %c0_17 = arith.constant 0 : index
    %27 = vector.load %arg5[%c4, %c0_16, %c0_17] : memref<9x8x4xf32, #tpu.memory_space<vmem>>, vector<1x8x4xf32>
    %28 = vector.shape_cast %27 : vector<1x8x4xf32> to vector<8x4xf32>
    %cst_18 = arith.constant dense<0.000000e+00> : vector<8x512xf32>
    %29 = tpu.matmul %28, %26, %cst_18 {dimension_numbers = #tpu.dot_dimension_numbers<[1], [0], [0], [1], [0, 0, 1, 1], [], []>} : vector<8x4xf32>, vector<4x512xf32>, vector<8x512xf32> -> vector<8x512xf32>
    %30 = arith.addf %25, %29 : vector<8x512xf32>
    %31 = vector.extract_strided_slice %5 {offsets = [0, 36], sizes = [4, 512], strides = [1, 1]} : vector<4x640xf32> to vector<4x512xf32>
    %c5 = arith.constant 5 : index
    %c0_19 = arith.constant 0 : index
    %c0_20 = arith.constant 0 : index
    %32 = vector.load %arg5[%c5, %c0_19, %c0_20] : memref<9x8x4xf32, #tpu.memory_space<vmem>>, vector<1x8x4xf32>
    %33 = vector.shape_cast %32 : vector<1x8x4xf32> to vector<8x4xf32>
    %cst_21 = arith.constant dense<0.000000e+00> : vector<8x512xf32>
    %34 = tpu.matmul %33, %31, %cst_21 {dimension_numbers = #tpu.dot_dimension_numbers<[1], [0], [0], [1], [0, 0, 1, 1], [], []>} : vector<8x4xf32>, vector<4x512xf32>, vector<8x512xf32> -> vector<8x512xf32>
    %35 = arith.addf %30, %34 : vector<8x512xf32>
    %36 = vector.extract_strided_slice %5 {offsets = [0, 68], sizes = [4, 512], strides = [1, 1]} : vector<4x640xf32> to vector<4x512xf32>
    %c6 = arith.constant 6 : index
    %c0_22 = arith.constant 0 : index
    %c0_23 = arith.constant 0 : index
    %37 = vector.load %arg5[%c6, %c0_22, %c0_23] : memref<9x8x4xf32, #tpu.memory_space<vmem>>, vector<1x8x4xf32>
    %38 = vector.shape_cast %37 : vector<1x8x4xf32> to vector<8x4xf32>
    %cst_24 = arith.constant dense<0.000000e+00> : vector<8x512xf32>
    %39 = tpu.matmul %38, %36, %cst_24 {dimension_numbers = #tpu.dot_dimension_numbers<[1], [0], [0], [1], [0, 0, 1, 1], [], []>} : vector<8x4xf32>, vector<4x512xf32>, vector<8x512xf32> -> vector<8x512xf32>
    %40 = arith.addf %35, %39 : vector<8x512xf32>
    %41 = vector.extract_strided_slice %5 {offsets = [0, 69], sizes = [4, 512], strides = [1, 1]} : vector<4x640xf32> to vector<4x512xf32>
    %c7 = arith.constant 7 : index
    %c0_25 = arith.constant 0 : index
    %c0_26 = arith.constant 0 : index
    %42 = vector.load %arg5[%c7, %c0_25, %c0_26] : memref<9x8x4xf32, #tpu.memory_space<vmem>>, vector<1x8x4xf32>
    %43 = vector.shape_cast %42 : vector<1x8x4xf32> to vector<8x4xf32>
    %cst_27 = arith.constant dense<0.000000e+00> : vector<8x512xf32>
    %44 = tpu.matmul %43, %41, %cst_27 {dimension_numbers = #tpu.dot_dimension_numbers<[1], [0], [0], [1], [0, 0, 1, 1], [], []>} : vector<8x4xf32>, vector<4x512xf32>, vector<8x512xf32> -> vector<8x512xf32>
    %45 = arith.addf %40, %44 : vector<8x512xf32>
    %46 = vector.extract_strided_slice %5 {offsets = [0, 70], sizes = [4, 512], strides = [1, 1]} : vector<4x640xf32> to vector<4x512xf32>
    %c8 = arith.constant 8 : index
    %c0_28 = arith.constant 0 : index
    %c0_29 = arith.constant 0 : index
    %47 = vector.load %arg5[%c8, %c0_28, %c0_29] : memref<9x8x4xf32, #tpu.memory_space<vmem>>, vector<1x8x4xf32>
    %48 = vector.shape_cast %47 : vector<1x8x4xf32> to vector<8x4xf32>
    %cst_30 = arith.constant dense<0.000000e+00> : vector<8x512xf32>
    %49 = tpu.matmul %48, %46, %cst_30 {dimension_numbers = #tpu.dot_dimension_numbers<[1], [0], [0], [1], [0, 0, 1, 1], [], []>} : vector<8x4xf32>, vector<4x512xf32>, vector<8x512xf32> -> vector<8x512xf32>
    %50 = arith.addf %45, %49 : vector<8x512xf32>
    %c0_31 = arith.constant 0 : index
    %c0_32 = arith.constant 0 : index
    %51 = vector.load %arg3[%c0_31, %c0_32] : memref<4x512xbf16, #tpu.memory_space<vmem>>, vector<4x512xbf16>
    %52 = arith.extf %51 : vector<4x512xbf16> to vector<4x512xf32>
    %c0_33 = arith.constant 0 : index
    %c0_34 = arith.constant 0 : index
    %53 = vector.load %arg4[%c0_33, %c0_34] : memref<4x128xbf16, #tpu.memory_space<vmem>>, vector<4x128xbf16>
    %54 = arith.extf %53 : vector<4x128xbf16> to vector<4x128xf32>
    %55 = tpu.concatenate %52, %54 in 1 : vector<4x512xf32>, vector<4x128xf32> -> vector<4x640xf32>
    %56 = vector.extract_strided_slice %55 {offsets = [0, 0], sizes = [4, 512], strides = [1, 1]} : vector<4x640xf32> to vector<4x512xf32>
    %c0_35 = arith.constant 0 : index
    %c0_36 = arith.constant 0 : index
    %c0_37 = arith.constant 0 : index
    %57 = vector.load %arg6[%c0_35, %c0_36, %c0_37] : memref<9x8x4xf32, #tpu.memory_space<vmem>>, vector<1x8x4xf32>
    %58 = vector.shape_cast %57 : vector<1x8x4xf32> to vector<8x4xf32>
    %cst_38 = arith.constant dense<0.000000e+00> : vector<8x512xf32>
    %59 = tpu.matmul %58, %56, %cst_38 {dimension_numbers = #tpu.dot_dimension_numbers<[1], [0], [0], [1], [0, 0, 1, 1], [], []>} : vector<8x4xf32>, vector<4x512xf32>, vector<8x512xf32> -> vector<8x512xf32>
    %60 = arith.addf %50, %59 : vector<8x512xf32>
    %61 = vector.extract_strided_slice %55 {offsets = [0, 1], sizes = [4, 512], strides = [1, 1]} : vector<4x640xf32> to vector<4x512xf32>
    %c1_39 = arith.constant 1 : index
    %c0_40 = arith.constant 0 : index
    %c0_41 = arith.constant 0 : index
    %62 = vector.load %arg6[%c1_39, %c0_40, %c0_41] : memref<9x8x4xf32, #tpu.memory_space<vmem>>, vector<1x8x4xf32>
    %63 = vector.shape_cast %62 : vector<1x8x4xf32> to vector<8x4xf32>
    %cst_42 = arith.constant dense<0.000000e+00> : vector<8x512xf32>
    %64 = tpu.matmul %63, %61, %cst_42 {dimension_numbers = #tpu.dot_dimension_numbers<[1], [0], [0], [1], [0, 0, 1, 1], [], []>} : vector<8x4xf32>, vector<4x512xf32>, vector<8x512xf32> -> vector<8x512xf32>
    %65 = arith.addf %60, %64 : vector<8x512xf32>
    %66 = vector.extract_strided_slice %55 {offsets = [0, 2], sizes = [4, 512], strides = [1, 1]} : vector<4x640xf32> to vector<4x512xf32>
    %c2_43 = arith.constant 2 : index
    %c0_44 = arith.constant 0 : index
    %c0_45 = arith.constant 0 : index
    %67 = vector.load %arg6[%c2_43, %c0_44, %c0_45] : memref<9x8x4xf32, #tpu.memory_space<vmem>>, vector<1x8x4xf32>
    %68 = vector.shape_cast %67 : vector<1x8x4xf32> to vector<8x4xf32>
    %cst_46 = arith.constant dense<0.000000e+00> : vector<8x512xf32>
    %69 = tpu.matmul %68, %66, %cst_46 {dimension_numbers = #tpu.dot_dimension_numbers<[1], [0], [0], [1], [0, 0, 1, 1], [], []>} : vector<8x4xf32>, vector<4x512xf32>, vector<8x512xf32> -> vector<8x512xf32>
    %70 = arith.addf %65, %69 : vector<8x512xf32>
    %71 = vector.extract_strided_slice %55 {offsets = [0, 34], sizes = [4, 512], strides = [1, 1]} : vector<4x640xf32> to vector<4x512xf32>
    %c3_47 = arith.constant 3 : index
    %c0_48 = arith.constant 0 : index
    %c0_49 = arith.constant 0 : index
    %72 = vector.load %arg6[%c3_47, %c0_48, %c0_49] : memref<9x8x4xf32, #tpu.memory_space<vmem>>, vector<1x8x4xf32>
    %73 = vector.shape_cast %72 : vector<1x8x4xf32> to vector<8x4xf32>
    %cst_50 = arith.constant dense<0.000000e+00> : vector<8x512xf32>
    %74 = tpu.matmul %73, %71, %cst_50 {dimension_numbers = #tpu.dot_dimension_numbers<[1], [0], [0], [1], [0, 0, 1, 1], [], []>} : vector<8x4xf32>, vector<4x512xf32>, vector<8x512xf32> -> vector<8x512xf32>
    %75 = arith.addf %70, %74 : vector<8x512xf32>
    %76 = vector.extract_strided_slice %55 {offsets = [0, 35], sizes = [4, 512], strides = [1, 1]} : vector<4x640xf32> to vector<4x512xf32>
    %c4_51 = arith.constant 4 : index
    %c0_52 = arith.constant 0 : index
    %c0_53 = arith.constant 0 : index
    %77 = vector.load %arg6[%c4_51, %c0_52, %c0_53] : memref<9x8x4xf32, #tpu.memory_space<vmem>>, vector<1x8x4xf32>
    %78 = vector.shape_cast %77 : vector<1x8x4xf32> to vector<8x4xf32>
    %cst_54 = arith.constant dense<0.000000e+00> : vector<8x512xf32>
    %79 = tpu.matmul %78, %76, %cst_54 {dimension_numbers = #tpu.dot_dimension_numbers<[1], [0], [0], [1], [0, 0, 1, 1], [], []>} : vector<8x4xf32>, vector<4x512xf32>, vector<8x512xf32> -> vector<8x512xf32>
    %80 = arith.addf %75, %79 : vector<8x512xf32>
    %81 = vector.extract_strided_slice %55 {offsets = [0, 36], sizes = [4, 512], strides = [1, 1]} : vector<4x640xf32> to vector<4x512xf32>
    %c5_55 = arith.constant 5 : index
    %c0_56 = arith.constant 0 : index
    %c0_57 = arith.constant 0 : index
    %82 = vector.load %arg6[%c5_55, %c0_56, %c0_57] : memref<9x8x4xf32, #tpu.memory_space<vmem>>, vector<1x8x4xf32>
    %83 = vector.shape_cast %82 : vector<1x8x4xf32> to vector<8x4xf32>
    %cst_58 = arith.constant dense<0.000000e+00> : vector<8x512xf32>
    %84 = tpu.matmul %83, %81, %cst_58 {dimension_numbers = #tpu.dot_dimension_numbers<[1], [0], [0], [1], [0, 0, 1, 1], [], []>} : vector<8x4xf32>, vector<4x512xf32>, vector<8x512xf32> -> vector<8x512xf32>
    %85 = arith.addf %80, %84 : vector<8x512xf32>
    %86 = vector.extract_strided_slice %55 {offsets = [0, 68], sizes = [4, 512], strides = [1, 1]} : vector<4x640xf32> to vector<4x512xf32>
    %c6_59 = arith.constant 6 : index
    %c0_60 = arith.constant 0 : index
    %c0_61 = arith.constant 0 : index
    %87 = vector.load %arg6[%c6_59, %c0_60, %c0_61] : memref<9x8x4xf32, #tpu.memory_space<vmem>>, vector<1x8x4xf32>
    %88 = vector.shape_cast %87 : vector<1x8x4xf32> to vector<8x4xf32>
    %cst_62 = arith.constant dense<0.000000e+00> : vector<8x512xf32>
    %89 = tpu.matmul %88, %86, %cst_62 {dimension_numbers = #tpu.dot_dimension_numbers<[1], [0], [0], [1], [0, 0, 1, 1], [], []>} : vector<8x4xf32>, vector<4x512xf32>, vector<8x512xf32> -> vector<8x512xf32>
    %90 = arith.addf %85, %89 : vector<8x512xf32>
    %91 = vector.extract_strided_slice %55 {offsets = [0, 69], sizes = [4, 512], strides = [1, 1]} : vector<4x640xf32> to vector<4x512xf32>
    %c7_63 = arith.constant 7 : index
    %c0_64 = arith.constant 0 : index
    %c0_65 = arith.constant 0 : index
    %92 = vector.load %arg6[%c7_63, %c0_64, %c0_65] : memref<9x8x4xf32, #tpu.memory_space<vmem>>, vector<1x8x4xf32>
    %93 = vector.shape_cast %92 : vector<1x8x4xf32> to vector<8x4xf32>
    %cst_66 = arith.constant dense<0.000000e+00> : vector<8x512xf32>
    %94 = tpu.matmul %93, %91, %cst_66 {dimension_numbers = #tpu.dot_dimension_numbers<[1], [0], [0], [1], [0, 0, 1, 1], [], []>} : vector<8x4xf32>, vector<4x512xf32>, vector<8x512xf32> -> vector<8x512xf32>
    %95 = arith.addf %90, %94 : vector<8x512xf32>
    %96 = vector.extract_strided_slice %55 {offsets = [0, 70], sizes = [4, 512], strides = [1, 1]} : vector<4x640xf32> to vector<4x512xf32>
    %c8_67 = arith.constant 8 : index
    %c0_68 = arith.constant 0 : index
    %c0_69 = arith.constant 0 : index
    %97 = vector.load %arg6[%c8_67, %c0_68, %c0_69] : memref<9x8x4xf32, #tpu.memory_space<vmem>>, vector<1x8x4xf32>
    %98 = vector.shape_cast %97 : vector<1x8x4xf32> to vector<8x4xf32>
    %cst_70 = arith.constant dense<0.000000e+00> : vector<8x512xf32>
    %99 = tpu.matmul %98, %96, %cst_70 {dimension_numbers = #tpu.dot_dimension_numbers<[1], [0], [0], [1], [0, 0, 1, 1], [], []>} : vector<8x4xf32>, vector<4x512xf32>, vector<8x512xf32> -> vector<8x512xf32>
    %100 = arith.addf %95, %99 : vector<8x512xf32>
    %c0_71 = arith.constant 0 : index
    %c0_72 = arith.constant 0 : index
    %101 = vector.load %arg7[%c0_71, %c0_72] : memref<8x1xf32, #tpu.memory_space<vmem>>, vector<8x1xf32>
    %102 = vector.broadcast %101 : vector<8x1xf32> to vector<8x512xf32>
    %103 = arith.addf %100, %102 : vector<8x512xf32>
    %cst_73 = arith.constant 1.000000e-01 : f32
    %104 = vector.broadcast %cst_73 : f32 to vector<8x512xf32>
    %105 = arith.mulf %103, %104 : vector<8x512xf32>
    %106 = arith.maximumf %103, %105 : vector<8x512xf32>
    %107 = arith.truncf %106 : vector<8x512xf32> to vector<8x512xbf16>
    %c0_74 = arith.constant 0 : index
    %c0_75 = arith.constant 0 : index
    %108 = vector.load %arg8[%c0_74, %c0_75] : memref<8x512xbf16, #tpu.memory_space<vmem>>, vector<8x512xbf16>
    tpu.vector_store %arg8[%c0_74, %c0_75], %107 {strides = array<i32>} : memref<8x512xbf16, #tpu.memory_space<vmem>>, vector<8x512xbf16>,
    return
  }
  func.func @transform_0(%arg0: i32) -> (i32, i32) {
    %c0_i32 = arith.constant 0 : i32
    %c0_i32_0 = arith.constant 0 : i32
    return %c0_i32, %arg0 : i32, i32
  }
  func.func @transform_1(%arg0: i32) -> (i32, i32) {
    %c1_i32 = arith.constant 1 : i32
    %0 = arith.addi %arg0, %c1_i32 : i32
    %c4_i32 = arith.constant 4 : i32
    %1 = arith.muli %0, %c4_i32 : i32
    %c0_i32 = arith.constant 0 : i32
    %c0_i32_0 = arith.constant 0 : i32
    return %c0_i32, %1 : i32, i32
  }
  func.func @transform_2(%arg0: i32) -> (i32, i32) {
    %c0_i32 = arith.constant 0 : i32
    %c0_i32_0 = arith.constant 0 : i32
    return %c0_i32, %arg0 : i32, i32
  }
  func.func @transform_3(%arg0: i32) -> (i32, i32) {
    %c1_i32 = arith.constant 1 : i32
    %0 = arith.addi %arg0, %c1_i32 : i32
    %c4_i32 = arith.constant 4 : i32
    %1 = arith.muli %0, %c4_i32 : i32
    %c0_i32 = arith.constant 0 : i32
    %c0_i32_0 = arith.constant 0 : i32
    return %c0_i32, %1 : i32, i32
  }
  func.func @transform_4(%arg0: i32) -> (i32, i32, i32) {
    %c0_i32 = arith.constant 0 : i32
    %c0_i32_0 = arith.constant 0 : i32
    %c0_i32_1 = arith.constant 0 : i32
    %c0_i32_2 = arith.constant 0 : i32
    return %c0_i32, %c0_i32_0, %c0_i32_1 : i32, i32, i32
  }
  func.func @transform_5(%arg0: i32) -> (i32, i32, i32) {
    %c0_i32 = arith.constant 0 : i32
    %c0_i32_0 = arith.constant 0 : i32
    %c0_i32_1 = arith.constant 0 : i32
    %c0_i32_2 = arith.constant 0 : i32
    return %c0_i32, %c0_i32_0, %c0_i32_1 : i32, i32, i32
  }
  func.func @transform_6(%arg0: i32) -> (i32, i32) {
    %c0_i32 = arith.constant 0 : i32
    %c0_i32_0 = arith.constant 0 : i32
    %c0_i32_1 = arith.constant 0 : i32
    return %c0_i32, %c0_i32_0 : i32, i32
  }
  func.func @transform_7(%arg0: i32) -> (i32, i32) {
    %c0_i32 = arith.constant 0 : i32
    %c0_i32_0 = arith.constant 0 : i32
    return %c0_i32, %arg0 : i32, i32
  }
}

module attributes {stable_mosaic.version = 11 : i64} {
  func.func @_fused_conv3x3_kernel(%arg0: i32, %arg1: memref<8x512xbf16, #tpu.memory_space<vmem>>, %arg2: memref<8x128xbf16, #tpu.memory_space<vmem>>, %arg3: memref<9x8x8xf32, #tpu.memory_space<vmem>>, %arg4: memref<8x1xf32, #tpu.memory_space<vmem>>, %arg5: memref<8x512xf32, #tpu.memory_space<vmem>>) attributes {dimension_semantics = [#tpu.dimension_semantics<parallel>], iteration_bounds = array<i64: 5>, scalar_prefetch = 0 : i64, scratch_operands = 0 : i64, tpu.core_type = #tpu.core_type<tc>, window_params = [{transform_indices = @transform_0, window_bounds = array<i64: 8, 512>}, {transform_indices = @transform_1, window_bounds = array<i64: 8, 128>}, {pipeline_mode = #tpu.pipeline_mode<synchronous>, transform_indices = @transform_2, window_bounds = array<i64: 9, 8, 8>}, {pipeline_mode = #tpu.pipeline_mode<synchronous>, transform_indices = @transform_3, window_bounds = array<i64: 8, 1>}, {transform_indices = @transform_4, window_bounds = array<i64: 8, 512>}]} {
    %cst = arith.constant 0.000000e+00 : f32
    %0 = vector.broadcast %cst : f32 to vector<8x512xf32>
    %c0 = arith.constant 0 : index
    %c0_0 = arith.constant 0 : index
    %1 = vector.load %arg1[%c0, %c0_0] : memref<8x512xbf16, #tpu.memory_space<vmem>>, vector<8x512xbf16>
    %2 = arith.extf %1 : vector<8x512xbf16> to vector<8x512xf32>
    %c0_1 = arith.constant 0 : index
    %c0_2 = arith.constant 0 : index
    %3 = vector.load %arg2[%c0_1, %c0_2] : memref<8x128xbf16, #tpu.memory_space<vmem>>, vector<8x128xbf16>
    %4 = arith.extf %3 : vector<8x128xbf16> to vector<8x128xf32>
    %5 = tpu.concatenate %2, %4 in 1 : vector<8x512xf32>, vector<8x128xf32> -> vector<8x640xf32>
    %6 = vector.extract_strided_slice %5 {offsets = [0, 0], sizes = [8, 512], strides = [1, 1]} : vector<8x640xf32> to vector<8x512xf32>
    %c0_3 = arith.constant 0 : index
    %c0_4 = arith.constant 0 : index
    %c0_5 = arith.constant 0 : index
    %7 = vector.load %arg3[%c0_3, %c0_4, %c0_5] : memref<9x8x8xf32, #tpu.memory_space<vmem>>, vector<1x8x8xf32>
    %8 = vector.shape_cast %7 : vector<1x8x8xf32> to vector<8x8xf32>
    %cst_6 = arith.constant dense<0.000000e+00> : vector<8x512xf32>
    %9 = tpu.matmul %8, %6, %cst_6 {dimension_numbers = #tpu.dot_dimension_numbers<[1], [0], [0], [1], [0, 0, 1, 1], [], []>} : vector<8x8xf32>, vector<8x512xf32>, vector<8x512xf32> -> vector<8x512xf32>
    %10 = arith.addf %0, %9 : vector<8x512xf32>
    %11 = vector.extract_strided_slice %5 {offsets = [0, 1], sizes = [8, 512], strides = [1, 1]} : vector<8x640xf32> to vector<8x512xf32>
    %c1 = arith.constant 1 : index
    %c0_7 = arith.constant 0 : index
    %c0_8 = arith.constant 0 : index
    %12 = vector.load %arg3[%c1, %c0_7, %c0_8] : memref<9x8x8xf32, #tpu.memory_space<vmem>>, vector<1x8x8xf32>
    %13 = vector.shape_cast %12 : vector<1x8x8xf32> to vector<8x8xf32>
    %cst_9 = arith.constant dense<0.000000e+00> : vector<8x512xf32>
    %14 = tpu.matmul %13, %11, %cst_9 {dimension_numbers = #tpu.dot_dimension_numbers<[1], [0], [0], [1], [0, 0, 1, 1], [], []>} : vector<8x8xf32>, vector<8x512xf32>, vector<8x512xf32> -> vector<8x512xf32>
    %15 = arith.addf %10, %14 : vector<8x512xf32>
    %16 = vector.extract_strided_slice %5 {offsets = [0, 2], sizes = [8, 512], strides = [1, 1]} : vector<8x640xf32> to vector<8x512xf32>
    %c2 = arith.constant 2 : index
    %c0_10 = arith.constant 0 : index
    %c0_11 = arith.constant 0 : index
    %17 = vector.load %arg3[%c2, %c0_10, %c0_11] : memref<9x8x8xf32, #tpu.memory_space<vmem>>, vector<1x8x8xf32>
    %18 = vector.shape_cast %17 : vector<1x8x8xf32> to vector<8x8xf32>
    %cst_12 = arith.constant dense<0.000000e+00> : vector<8x512xf32>
    %19 = tpu.matmul %18, %16, %cst_12 {dimension_numbers = #tpu.dot_dimension_numbers<[1], [0], [0], [1], [0, 0, 1, 1], [], []>} : vector<8x8xf32>, vector<8x512xf32>, vector<8x512xf32> -> vector<8x512xf32>
    %20 = arith.addf %15, %19 : vector<8x512xf32>
    %21 = vector.extract_strided_slice %5 {offsets = [0, 34], sizes = [8, 512], strides = [1, 1]} : vector<8x640xf32> to vector<8x512xf32>
    %c3 = arith.constant 3 : index
    %c0_13 = arith.constant 0 : index
    %c0_14 = arith.constant 0 : index
    %22 = vector.load %arg3[%c3, %c0_13, %c0_14] : memref<9x8x8xf32, #tpu.memory_space<vmem>>, vector<1x8x8xf32>
    %23 = vector.shape_cast %22 : vector<1x8x8xf32> to vector<8x8xf32>
    %cst_15 = arith.constant dense<0.000000e+00> : vector<8x512xf32>
    %24 = tpu.matmul %23, %21, %cst_15 {dimension_numbers = #tpu.dot_dimension_numbers<[1], [0], [0], [1], [0, 0, 1, 1], [], []>} : vector<8x8xf32>, vector<8x512xf32>, vector<8x512xf32> -> vector<8x512xf32>
    %25 = arith.addf %20, %24 : vector<8x512xf32>
    %26 = vector.extract_strided_slice %5 {offsets = [0, 35], sizes = [8, 512], strides = [1, 1]} : vector<8x640xf32> to vector<8x512xf32>
    %c4 = arith.constant 4 : index
    %c0_16 = arith.constant 0 : index
    %c0_17 = arith.constant 0 : index
    %27 = vector.load %arg3[%c4, %c0_16, %c0_17] : memref<9x8x8xf32, #tpu.memory_space<vmem>>, vector<1x8x8xf32>
    %28 = vector.shape_cast %27 : vector<1x8x8xf32> to vector<8x8xf32>
    %cst_18 = arith.constant dense<0.000000e+00> : vector<8x512xf32>
    %29 = tpu.matmul %28, %26, %cst_18 {dimension_numbers = #tpu.dot_dimension_numbers<[1], [0], [0], [1], [0, 0, 1, 1], [], []>} : vector<8x8xf32>, vector<8x512xf32>, vector<8x512xf32> -> vector<8x512xf32>
    %30 = arith.addf %25, %29 : vector<8x512xf32>
    %31 = vector.extract_strided_slice %5 {offsets = [0, 36], sizes = [8, 512], strides = [1, 1]} : vector<8x640xf32> to vector<8x512xf32>
    %c5 = arith.constant 5 : index
    %c0_19 = arith.constant 0 : index
    %c0_20 = arith.constant 0 : index
    %32 = vector.load %arg3[%c5, %c0_19, %c0_20] : memref<9x8x8xf32, #tpu.memory_space<vmem>>, vector<1x8x8xf32>
    %33 = vector.shape_cast %32 : vector<1x8x8xf32> to vector<8x8xf32>
    %cst_21 = arith.constant dense<0.000000e+00> : vector<8x512xf32>
    %34 = tpu.matmul %33, %31, %cst_21 {dimension_numbers = #tpu.dot_dimension_numbers<[1], [0], [0], [1], [0, 0, 1, 1], [], []>} : vector<8x8xf32>, vector<8x512xf32>, vector<8x512xf32> -> vector<8x512xf32>
    %35 = arith.addf %30, %34 : vector<8x512xf32>
    %36 = vector.extract_strided_slice %5 {offsets = [0, 68], sizes = [8, 512], strides = [1, 1]} : vector<8x640xf32> to vector<8x512xf32>
    %c6 = arith.constant 6 : index
    %c0_22 = arith.constant 0 : index
    %c0_23 = arith.constant 0 : index
    %37 = vector.load %arg3[%c6, %c0_22, %c0_23] : memref<9x8x8xf32, #tpu.memory_space<vmem>>, vector<1x8x8xf32>
    %38 = vector.shape_cast %37 : vector<1x8x8xf32> to vector<8x8xf32>
    %cst_24 = arith.constant dense<0.000000e+00> : vector<8x512xf32>
    %39 = tpu.matmul %38, %36, %cst_24 {dimension_numbers = #tpu.dot_dimension_numbers<[1], [0], [0], [1], [0, 0, 1, 1], [], []>} : vector<8x8xf32>, vector<8x512xf32>, vector<8x512xf32> -> vector<8x512xf32>
    %40 = arith.addf %35, %39 : vector<8x512xf32>
    %41 = vector.extract_strided_slice %5 {offsets = [0, 69], sizes = [8, 512], strides = [1, 1]} : vector<8x640xf32> to vector<8x512xf32>
    %c7 = arith.constant 7 : index
    %c0_25 = arith.constant 0 : index
    %c0_26 = arith.constant 0 : index
    %42 = vector.load %arg3[%c7, %c0_25, %c0_26] : memref<9x8x8xf32, #tpu.memory_space<vmem>>, vector<1x8x8xf32>
    %43 = vector.shape_cast %42 : vector<1x8x8xf32> to vector<8x8xf32>
    %cst_27 = arith.constant dense<0.000000e+00> : vector<8x512xf32>
    %44 = tpu.matmul %43, %41, %cst_27 {dimension_numbers = #tpu.dot_dimension_numbers<[1], [0], [0], [1], [0, 0, 1, 1], [], []>} : vector<8x8xf32>, vector<8x512xf32>, vector<8x512xf32> -> vector<8x512xf32>
    %45 = arith.addf %40, %44 : vector<8x512xf32>
    %46 = vector.extract_strided_slice %5 {offsets = [0, 70], sizes = [8, 512], strides = [1, 1]} : vector<8x640xf32> to vector<8x512xf32>
    %c8 = arith.constant 8 : index
    %c0_28 = arith.constant 0 : index
    %c0_29 = arith.constant 0 : index
    %47 = vector.load %arg3[%c8, %c0_28, %c0_29] : memref<9x8x8xf32, #tpu.memory_space<vmem>>, vector<1x8x8xf32>
    %48 = vector.shape_cast %47 : vector<1x8x8xf32> to vector<8x8xf32>
    %cst_30 = arith.constant dense<0.000000e+00> : vector<8x512xf32>
    %49 = tpu.matmul %48, %46, %cst_30 {dimension_numbers = #tpu.dot_dimension_numbers<[1], [0], [0], [1], [0, 0, 1, 1], [], []>} : vector<8x8xf32>, vector<8x512xf32>, vector<8x512xf32> -> vector<8x512xf32>
    %50 = arith.addf %45, %49 : vector<8x512xf32>
    %c0_31 = arith.constant 0 : index
    %c0_32 = arith.constant 0 : index
    %51 = vector.load %arg4[%c0_31, %c0_32] : memref<8x1xf32, #tpu.memory_space<vmem>>, vector<8x1xf32>
    %52 = vector.broadcast %51 : vector<8x1xf32> to vector<8x512xf32>
    %53 = arith.addf %50, %52 : vector<8x512xf32>
    %cst_33 = arith.constant 1.000000e-01 : f32
    %54 = vector.broadcast %cst_33 : f32 to vector<8x512xf32>
    %55 = arith.mulf %53, %54 : vector<8x512xf32>
    %56 = arith.maximumf %53, %55 : vector<8x512xf32>
    %c0_34 = arith.constant 0 : index
    %c0_35 = arith.constant 0 : index
    %57 = vector.load %arg5[%c0_34, %c0_35] : memref<8x512xf32, #tpu.memory_space<vmem>>, vector<8x512xf32>
    tpu.vector_store %arg5[%c0_34, %c0_35], %56 {strides = array<i32>} : memref<8x512xf32, #tpu.memory_space<vmem>>, vector<8x512xf32>,
    return
  }
  func.func @transform_0(%arg0: i32) -> (i32, i32) {
    %c0_i32 = arith.constant 0 : i32
    %c0_i32_0 = arith.constant 0 : i32
    return %c0_i32, %arg0 : i32, i32
  }
  func.func @transform_1(%arg0: i32) -> (i32, i32) {
    %c1_i32 = arith.constant 1 : i32
    %0 = arith.addi %arg0, %c1_i32 : i32
    %c4_i32 = arith.constant 4 : i32
    %1 = arith.muli %0, %c4_i32 : i32
    %c0_i32 = arith.constant 0 : i32
    %c0_i32_0 = arith.constant 0 : i32
    return %c0_i32, %1 : i32, i32
  }
  func.func @transform_2(%arg0: i32) -> (i32, i32, i32) {
    %c0_i32 = arith.constant 0 : i32
    %c0_i32_0 = arith.constant 0 : i32
    %c0_i32_1 = arith.constant 0 : i32
    %c0_i32_2 = arith.constant 0 : i32
    return %c0_i32, %c0_i32_0, %c0_i32_1 : i32, i32, i32
  }
  func.func @transform_3(%arg0: i32) -> (i32, i32) {
    %c0_i32 = arith.constant 0 : i32
    %c0_i32_0 = arith.constant 0 : i32
    %c0_i32_1 = arith.constant 0 : i32
    return %c0_i32, %c0_i32_0 : i32, i32
  }
  func.func @transform_4(%arg0: i32) -> (i32, i32) {
    %c0_i32 = arith.constant 0 : i32
    %c0_i32_0 = arith.constant 0 : i32
    return %c0_i32, %arg0 : i32, i32
  }
}

</mosaic_0001>

<bundles_post_ra>
// kernel: up_forward.3
= control target key start
LH: loop header
LB: loop body
LE: loop exit
PB: predicated region body
PF: predicated region fallthrough
CT: control target
= control target key end

     0   :  { %s478_s12 = smov 0   ;;  %s480_s13 = smov 0   ;;  %s543_s0 = inlined_call_operand.vmem [shape: bf16[4,512], index: 0, kind: input, shape index: {}]   ;;  %s544_s1 = inlined_call_operand.vmem [shape: f32[16,4], index: 1, kind: input, shape index: {}]   ;;  %s545_s2 = inlined_call_operand.vmem [shape: f32[16,1], index: 2, kind: input, shape index: {}]   ;;  %s546_s3 = inlined_call_operand.vmem [shape: bf16[16,512], index: 3, kind: output, shape index: {}]  }
   0x1   :  { %s482_s14 = smov 0  }
   0x2 LB: > { %s491_s15 = sadd.s32 4294967295, %s455_s14   ;;  %s493_s16 = sadd.s32 1, %s455_s14   ;;  %s455_s14 = sphi %s482_s14, %s550_s14   ;;  %s451_s13 = sphi %s480_s13, %s549_s13   ;;  %s447_s12 = sphi %s478_s12, %s548_s12  }
   0x3   : > { %s85_s17 = ssub.s32 %s455_s14, %s493_s16  ;;  %s88_s18 = sadd.s32 1, %s451_s13 }
   0x4   : > { %p86_p0 = scmp.eq.s32.totalorder %s85_s17, 0  ;;  %p98_p1 = scmp.ne.s32.totalorder %s451_s13, %s447_s12 }
   0x5   : > { %p99_p2 = scmp.eq.s32.totalorder %s491_s15, 3  ;;  %p380_p3 = scmp.ge.s32.totalorder %s455_s14, 1 }
   0x6   : > { %s501_s19 = scalar_select %p86_p0, %s451_s13, %s88_s18  }
   0x7   : > { %p503_p4 = por %p99_p2, %p98_p1  ;;  %p136_p5 = scmp.lt.s32.totalorder %s455_s14, 5 }
   0x9   : > { %p137_p6 = pnand %p380_p3, %p136_p5 }
   0xa   : > { %p158_p7 = scmp.lt.s32.totalorder (!%p137_p6), %s491_s15, 3  ;;  %v164_v0 = vld [vmem:[%s544_s1] sm:$0xff] (!%p137_p6)  ;;  %vm178_vm0 = vcmask (!%p137_p6), 31744   ;;  %v457_v1 = vmov (!%p137_p6), 0   ;;  %v167_v3 = vld [vmem:[%s545_s2 + $0x8] sm:$0xff] (!%p137_p6)  ;;  %vm185_vm1 = vcmask (!%p137_p6), 1043456  }
   0xb   : > { %140 = sbr.rel (%p137_p6) target bundleno = 253 (0xfd), region = 32  ;;  %404 = vmatprep.mubr.msk.f32.mxu0 (!%p137_p6), %vm178_vm0, %v164_v0  ;;  %432 = vset.pattern.permute.xlu0 (!%p137_p6), %v457_v1  ;;  %v166_v2 = vld [vmem:[%s545_s2] sm:$0xff] (!%p137_p6)  ;;  %v165_v6 = vld [vmem:[%s544_s1 + $0x8] sm:$0xff] (!%p137_p6)  ;;  %s155_s7 = sand.u32 (!%p137_p6), 1, %s447_s12  }
   0xc   : > { %170 = vperm.xlu0 (!%p137_p6), %432, %v166_v2   ;;  %s381_s8 = sshll.u32 (!%p137_p6), %s155_s7, 3 }
   0xd   : > { %s157_s9 = scalar_lea.vmem (!%p137_p6), [#allocation2], %s381_s8 }
  0x10   : > { %175 = vperm.xlu0 (!%p137_p6), %432, %v167_v3  }
  0x12   : > { %s159_s25 = scalar_select %p158_p7, %s491_s15, 3 }
  0x13   : > { %s389_s10 = sshll.u32 (%p503_p4), %s491_s15, 2 }
  0x14   : > { %s382_s28 = sshll.u32 %s159_s25, 1  ;;  %s282_s12 = scalar_lea.vmem (%p503_p4), %s546_s3, %s389_s10 }
  0x15   : > { %s161_s4 = scalar_lea.vmem %s543_s0, %s382_s28 }
  0x16   : > { %v162_v4 = vld [vmem:[%s161_s4] sm:$0x3] }
  0x17   : > { %v163_v5 = vunpack.c.l.bf16 %v162_v4 }
  0x19   : > { %402 = vmatprep.subr.msk.mxu0 %vm185_vm1, %v163_v5 }
  0x1a   : > { %403 = vmatpush3.msk.msra.mxu0 %vm185_vm1, %v163_v5 }
  0x1b   : > { %405 = vmatmul.mubr.msk.f32.vlgmr.msra.gmra.mrb[0].mxu0 %vm178_vm0, %v165_v6 }
  0x8b   : > { %v171_v7 = vpop.permute.xlu0 %170 }
  0x8f   : > { %v176_v8 = vpop.permute.xlu0 %175 }
  0xee   : > { %v406_v9 = vpop.f32.mrb[0].mxu0  ;;  %280 = sbr.rel (!%p503_p4) target bundleno = 253 (0xfd), region = 36 }
  0xef   : > { %v261_v10 = vadd.f32 %v406_v9, %v176_v8  ;;  %v255_v11 = vpop.f32.mrb[1].mxu0 }
  0xf0   : > { %v256_v12 = vadd.f32 %v255_v11, %v171_v7 }
  0xf2   : > { %v397_v13 = vpack.c.bf16 %v261_v10, %v256_v12 }
  0xf4   : > { %398 = vst [vmem:[%s157_s9] sm:$0xff] %v397_v13  }
  0xfb   : > { %v298_v14 = vld [vmem:[%s157_s9] sm:$0xf]  ;;  %v300_v15 = vld [vmem:[%s157_s9 + $0x4] sm:$0xf] }
  0xfc   : > { %299 = vst [vmem:[%s282_s12] sm:$0xf] %v298_v14  ;;  %301 = vst [vmem:[%s282_s12 + $0x10] sm:$0xf] %v300_v15 }
  0xfd PF: > { %p10_p8 = scmp.ge.s32.totalorder %s493_s16, 6   ;;  %s548_s12 = smov %s451_s13 }
  0xfe   : > { %s549_s13 = smov %s501_s19  ;;  %s550_s14 = smov %s493_s16 }
  0xff   :  { %12 = sbr.rel (!%p10_p8) target bundleno = 2 (0x2), region = 103 }

// kernel: up_forward.4
= control target key start
LH: loop header
LB: loop body
LE: loop exit
PB: predicated region body
PF: predicated region fallthrough
CT: control target
= control target key end

     0   :  { %s4106_s24 = smov 0   ;;  %s4520_s0 = inlined_call_operand.vmem [shape: bf16[4,2688], index: 0, kind: input, shape index: {}, may-alias: {0,1}]   ;;  %s4521_s1 = inlined_call_operand.vmem [shape: bf16[4,2688], index: 1, kind: input, shape index: {}, may-alias: {0,1}]   ;;  %s4522_s2 = inlined_call_operand.vmem [shape: bf16[4,2688], index: 2, kind: input, shape index: {}, may-alias: {2,3}]   ;;  %s4523_s3 = inlined_call_operand.vmem [shape: bf16[4,2688], index: 3, kind: input, shape index: {}, may-alias: {2,3}]   ;;  %s4524_s4 = inlined_call_operand.vmem [shape: f32[9,8,4], index: 4, kind: input, shape index: {}]   ;;  %s4525_s5 = inlined_call_operand.vmem [shape: f32[9,8,4], index: 5, kind: input, shape index: {}]   ;;  %s4526_s6 = inlined_call_operand.vmem [shape: f32[8,1], index: 6, kind: input, shape index: {}]   ;;  %s4527_s7 = inlined_call_operand.vmem [shape: bf16[8,2560], index: 7, kind: output, shape index: {}]  }
   0x1 LB: > { %s3640_s25 = sadd.s32 4294967295, %s4054_s24   ;;  %p3648_p0 = scmp.ge.s32.totalorder %s4054_s24, 1  ;;  %s4054_s24 = sphi %s4106_s24, %s17_s24  }
   0x2   : > { %p299_p1 = scmp.lt.s32.totalorder %s4054_s24, 6 }
   0x4   : > { %p300_p2 = pnand %p3648_p0, %p299_p1 }
   0x5   : > { %s4114_s26 = sshll.u32 (!%p300_p2), %s3640_s25, 2  ;;  %v4056_v0 = vmov (!%p300_p2), 0.0   ;;  %s4057_s14 = smov (!%p300_p2), 127   ;;  %vm429_vm0 = vcmask (!%p300_p2), 1039360   ;;  %vm438_vm1 = vcmask (!%p300_p2), 1043456   ;;  %vm754_vm2 = vcmask (!%p300_p2), 1031168  }
   0x6   : > { %303 = sbr.rel (%p300_p2) target bundleno = 506 (0x1fa), region = 48  ;;  %p361_p3 = scmp.lt.s32.totalorder (!%p300_p2), %s4114_s26, 20  ;;  %511 = vmatprep.mubr.f32.mxu0 (!%p300_p2), %v4056_v0  ;;  %582 = vmatprep.mubr.f32.mxu1 (!%p300_p2), %v4056_v0  ;;  %v3659_v28 = vld [vmem:[%s4524_s4 + $0x8] sm:$0xff] (!%p300_p2)  ;;  %vm434_vm3 = vcmask (!%p300_p2), 31744   ;;  %v415_v40 = vld [vmem:[%s4524_s4] sm:$0xff] (!%p300_p2)  ;;  %vm928_vm4 = vcmask (!%p300_p2), 769024  }
   0x7   : > { %s3796_s27 = sadd.s32 (!%p300_p2), 4, %s4114_s26  ;;  %s4058_s15 = smov (!%p300_p2), 126   ;;  %vm1102_vm5 = vcmask (!%p300_p2), 760832   ;;  %v3512_v55 = vld [vmem:[%s4526_s6] sm:$0xff] (!%p300_p2)  ;;  %v3672_v56 = vld [vmem:[%s4524_s4 + $0x10] sm:$0xff] (!%p300_p2)  ;;  %v4065_v60 = vmov (!%p300_p2), 0  }
   0x8   : > { %p372_p4 = scmp.lt.s32.totalorder (!%p300_p2), %s3796_s27, 20  ;;  %s4059_s16 = smov (!%p300_p2), 94   ;;  %4047 = vset.pattern.permute.xlu0 (!%p300_p2), %v4065_v60  ;;  %vm1276_vm6 = vcmask (!%p300_p2), 752640   ;;  %vm1450_vm7 = vcmask (!%p300_p2), 490496   ;;  %vm1624_vm8 = vcmask (!%p300_p2), 482304   ;;  %vm1798_vm9 = vcmask (!%p300_p2), 474112  }
   0x9   : > { %s4060_s17 = smov (!%p300_p2), 93   ;;  %s4061_s18 = smov (!%p300_p2), 92  }
   0xa   : > { %s4062_s19 = smov (!%p300_p2), 60   ;;  %s4063_s8 = smov (!%p300_p2), 59  }
   0xb   : > { %p401_p5 = scmp.lt.s32.totalorder (!%p300_p2), %s4114_s26, 19 }
   0xd   : > { %s4119_s28 = scalar_select %p361_p3, %s4114_s26, 20 }
   0xe   : > { %s4529_s27 = smov (!%p372_p4, %s3796_s27), 20  ;;  %s4531_s26 = smov (!%p401_p5, %s4114_s26), 19 }
   0xf   : > { %s3650_s29 = sshll.u32 %s4119_s28, 1  ;;  %s3652_s10 = sshll.u32 %s4529_s27, 1 }
  0x10   : > { %s364_s9 = scalar_lea.vmem %s4520_s0, %s3650_s29  ;;  %s375_s13 = scalar_lea.vmem %s4521_s1, %s3652_s10 }
  0x11   : > { %v406_v1 = vld [vmem:[%s364_s9] sm:$0xff]  ;;  %s386_s22 = scalar_lea.vmem %s4522_s2, %s3650_s29  ;;  %s397_s30 = scalar_lea.vmem %s4523_s3, %s3652_s10 }
  0x12   : > { %v4132_v2 = vunpack.c.l.bf16 %v406_v1  ;;  %v4134_v3 = vunpack.c.h.bf16 %v406_v1  ;;  %v409_v4 = vld [vmem:[%s375_s13] sm:$0x3]  ;;  %s4064_s28 = smov 58   ;;  %s3658_s25 = sshll.u32 %s4531_s26, 2 }
  0x13   : > { %v410_v6 = vunpack.c.l.bf16 %v409_v4  ;;  %v1960_v10 = vld [vmem:[%s386_s22] sm:$0xff] }
  0x14   : > { %v4143_v5 = vcombine.high %v4132_v2, %v4132_v2  ;;  %419 = vrot.lane.b32.xlu1 %v4132_v2, %s4057_s14  ;;  %v4149_v7 = vcombine.high %v4134_v3, %v4134_v3  ;;  %v4187_v11 = vunpack.c.h.bf16 %v1960_v10  ;;  %v1963_v12 = vld [vmem:[%s397_s30] sm:$0x3]  ;;  %v4191_v13 = vunpack.c.l.bf16 %v1960_v10 }
  0x15   : > { %v1964_v14 = vunpack.c.l.bf16 %v1963_v12 }
  0x16   : > { %v3887_v8 = vpack.i.bf16 %v4134_v3, %v4143_v5  ;;  %v3892_v9 = vpack.i.bf16 %v410_v6, %v4149_v7  ;;  %v4195_v15 = vcombine.high %v4187_v11, %v4187_v11  ;;  %v4203_v16 = vcombine.high %v4191_v13, %v4191_v13 }
  0x18   : > { %3888 = vrot.lane.b32.xlu0 %v3887_v8, %s4057_s14  ;;  %3898 = vrot.lane.b32.xlu1 %v3887_v8, %s4058_s15  ;;  %v3972_v17 = vpack.i.bf16 %v1964_v14, %v4195_v15  ;;  %v3967_v18 = vpack.i.bf16 %v4187_v11, %v4203_v16 }
  0x1c   : > { %3893 = vrot.lane.b32.xlu0 %v3892_v9, %s4057_s14  ;;  %744 = vrot.lane.b32.xlu1 %v4132_v2, %s4058_s15 }
  0x20   : > { %3903 = vrot.lane.b32.xlu0 %v3892_v9, %s4058_s15  ;;  %3913 = vrot.lane.b32.xlu1 %v3892_v9, %s4059_s16 }
  0x24   : > { %3908 = vrot.lane.b32.xlu0 %v3887_v8, %s4059_s16  ;;  %3918 = vrot.lane.b32.xlu1 %v3887_v8, %s4060_s17 }
  0x28   : > { %918 = vrot.lane.b32.xlu0 %v4132_v2, %s4059_s16  ;;  %1092 = vrot.lane.b32.xlu1 %v4132_v2, %s4060_s17 }
  0x2c   : > { %3923 = vrot.lane.b32.xlu0 %v3892_v9, %s4060_s17  ;;  %3933 = vrot.lane.b32.xlu1 %v3892_v9, %s4061_s18 }
  0x30   : > { %3928 = vrot.lane.b32.xlu0 %v3887_v8, %s4061_s18  ;;  %3938 = vrot.lane.b32.xlu1 %v3887_v8, %s4062_s19 }
  0x34   : > { %1266 = vrot.lane.b32.xlu0 %v4132_v2, %s4061_s18  ;;  %1440 = vrot.lane.b32.xlu1 %v4132_v2, %s4062_s19 }
  0x38   : > { %3943 = vrot.lane.b32.xlu0 %v3892_v9, %s4062_s19  ;;  %3953 = vrot.lane.b32.xlu1 %v3892_v9, %s4063_s8 }
  0x3c   : > { %3948 = vrot.lane.b32.xlu0 %v3887_v8, %s4063_s8  ;;  %3958 = vrot.lane.b32.xlu1 %v3887_v8, %s4064_s28 }
  0x40   : > { %1614 = vrot.lane.b32.xlu0 %v4132_v2, %s4063_s8  ;;  %1788 = vrot.lane.b32.xlu1 %v4132_v2, %s4064_s28 }
  0x44   : > { %3963 = vrot.lane.b32.xlu0 %v3892_v9, %s4064_s28  ;;  %3973 = vrot.lane.b32.xlu1 %v3972_v17, %s4057_s14 }
  0x48   : > { %3968 = vrot.lane.b32.xlu0 %v3967_v18, %s4057_s14  ;;  %3978 = vrot.lane.b32.xlu1 %v3967_v18, %s4058_s15 }
  0x4c   : > { %2130 = vrot.lane.b32.xlu0 %v4191_v13, %s4057_s14  ;;  %2303 = vrot.lane.b32.xlu1 %v4191_v13, %s4058_s15 }
  0x50   : > { %3983 = vrot.lane.b32.xlu0 %v3972_v17, %s4058_s15  ;;  %3993 = vrot.lane.b32.xlu1 %v3972_v17, %s4059_s16 }
  0x54   : > { %3988 = vrot.lane.b32.xlu0 %v3967_v18, %s4059_s16  ;;  %3998 = vrot.lane.b32.xlu1 %v3967_v18, %s4060_s17 }
  0x58   : > { %2476 = vrot.lane.b32.xlu0 %v4191_v13, %s4059_s16  ;;  %2649 = vrot.lane.b32.xlu1 %v4191_v13, %s4060_s17 }
  0x5c   : > { %4003 = vrot.lane.b32.xlu0 %v3972_v17, %s4060_s17  ;;  %4013 = vrot.lane.b32.xlu1 %v3972_v17, %s4061_s18 }
  0x60   : > { %4008 = vrot.lane.b32.xlu0 %v3967_v18, %s4061_s18  ;;  %4018 = vrot.lane.b32.xlu1 %v3967_v18, %s4062_s19 }
  0x64   : > { %2822 = vrot.lane.b32.xlu0 %v4191_v13, %s4061_s18  ;;  %2995 = vrot.lane.b32.xlu1 %v4191_v13, %s4062_s19 }
  0x68   : > { %4023 = vrot.lane.b32.xlu0 %v3972_v17, %s4062_s19  ;;  %4033 = vrot.lane.b32.xlu1 %v3972_v17, %s4063_s8 }
  0x6c   : > { %4028 = vrot.lane.b32.xlu0 %v3967_v18, %s4063_s8  ;;  %4038 = vrot.lane.b32.xlu1 %v3967_v18, %s4064_s28 }
  0x70   : > { %3168 = vrot.lane.b32.xlu0 %v4191_v13, %s4063_s8  ;;  %3341 = vrot.lane.b32.xlu1 %v4191_v13, %s4064_s28 }
  0x74   : > { %4043 = vrot.lane.b32.xlu0 %v3972_v17, %s4064_s28  ;;  %s404_s28 = scalar_lea.vmem %s4527_s7, %s3658_s25 }
  0x78   : > { %3515 = vperm.xlu0 %4047, %v3512_v55   ;;  %v3707_v55 = vld [vmem:[%s4524_s4 + $0x38] sm:$0xff] }
  0x86   : > { %v420_v19 = vpop.permute.xlu1 %419 }
  0x8a   : > { %v3889_v20 = vpop.permute.xlu0 %3888  ;;  %v3899_v21 = vpop.permute.xlu1 %3898 }
  0x8b   : > { %v3891_v22 = vunpack.i.h.bf16 %v3889_v20  ;;  %v3890_v23 = vunpack.i.l.bf16 %v3889_v20  ;;  %v3901_v24 = vunpack.i.h.bf16 %v3899_v21  ;;  %v3900_v25 = vunpack.i.l.bf16 %v3899_v21 }
  0x8d   : > { %v431_v26 = vsel %vm429_vm0, %v3890_v23, %v3891_v22  ;;  %v430_v27 = vsel %vm429_vm0, %v420_v19, %v3890_v23  ;;  %v756_v33 = vsel %vm754_vm2, %v3900_v25, %v3901_v24  ;;  %v3686_v23 = vld [vmem:[%s4524_s4 + $0x20] sm:$0xff] }
  0x8e   : > { %v3894_v29 = vpop.permute.xlu0 %3893  ;;  %3660 = vmatprep.subr.msk.mxu0 %vm438_vm1, %v431_v26  ;;  %v745_v30 = vpop.permute.xlu1 %744 }
  0x8f   : > { %v3896_v31 = vunpack.i.h.bf16 %v3894_v29  ;;  %v3895_v32 = vunpack.i.l.bf16 %v3894_v29  ;;  %3661 = vmatpush1.msk.msra.mxu0 %vm438_vm1, %v430_v27  ;;  %v755_v42 = vsel %vm754_vm2, %v745_v30, %v3900_v25 }
  0x90   : > { %3662 = vmatmul.mubr.msk.f32.vlgmr.msra.gmra.mrb[0].mxu0 %vm434_vm3, %v3659_v28  ;;  %3666 = vmatprep.subr.msk.mxu0 %vm438_vm1, %v4143_v5 }
  0x91   : > { %v433_v34 = vsel %vm429_vm0, %v3895_v32, %v3896_v31  ;;  %v432_v35 = vsel %vm429_vm0, %v3891_v22, %v3895_v32  ;;  %3667 = vmatpush1.msk.msra.mxu0 %vm438_vm1, %v4132_v2  ;;  %664 = vmatprep.mubr.f32.mxu0 %v4056_v0 }
  0x92   : > { %3663 = vmatprep.subr.msk.mxu1 %vm438_vm1, %v433_v34  ;;  %v3904_v36 = vpop.permute.xlu0 %3903  ;;  %3673 = vmatprep.subr.msk.mxu0 %vm438_vm1, %v756_v33  ;;  %v3914_v37 = vpop.permute.xlu1 %3913 }
  0x93   : > { %3664 = vmatpush1.msk.msra.mxu1 %vm438_vm1, %v432_v35  ;;  %v3906_v38 = vunpack.i.h.bf16 %v3904_v36  ;;  %v3905_v39 = vunpack.i.l.bf16 %v3904_v36  ;;  %v3916_v46 = vunpack.i.h.bf16 %v3914_v37  ;;  %v3915_v47 = vunpack.i.l.bf16 %v3914_v37  ;;  %v3693_v35 = vld [vmem:[%s4524_s4 + $0x28] sm:$0xff] }
  0x94   : > { %3665 = vmatmul.mubr.msk.f32.vlgmr.msra.gmra.mrb[0].mxu1 %vm434_vm3, %v3659_v28  ;;  %3669 = vmatprep.subr.msk.mxu1 %vm438_vm1, %v4149_v7  ;;  %v3679_v7 = vld [vmem:[%s4524_s4 + $0x18] sm:$0xff] }
  0x95   : > { %3670 = vmatpush1.msk.msra.mxu1 %vm438_vm1, %v4134_v3  ;;  %735 = vmatprep.mubr.f32.mxu1 %v4056_v0  ;;  %v758_v41 = vsel %vm754_vm2, %v3905_v39, %v3906_v38  ;;  %v757_v50 = vsel %vm754_vm2, %v3901_v24, %v3905_v39  ;;  %v932_v52 = vsel %vm928_vm4, %v3915_v47, %v3916_v46 }
  0x96   : > { %3676 = vmatprep.subr.msk.mxu1 %vm438_vm1, %v758_v41  ;;  %v3909_v43 = vpop.permute.xlu0 %3908  ;;  %v3919_v48 = vpop.permute.xlu1 %3918 }
  0x97   : > { %v3911_v44 = vunpack.i.h.bf16 %v3909_v43  ;;  %v3910_v45 = vunpack.i.l.bf16 %v3909_v43  ;;  %v3921_v53 = vunpack.i.h.bf16 %v3919_v48  ;;  %v3920_v54 = vunpack.i.l.bf16 %v3919_v48 }
  0x98   : > { %3668 = vmatmul.mubr.msk.f32.vlgmr.msra.gmra.mrb[0].mxu0 %vm434_vm3, %v415_v40 }
  0x99   : > { %3674 = vmatpush1.msk.msra.mxu0 %vm438_vm1, %v755_v42  ;;  %834 = vmatprep.mubr.f32.mxu0 %v4056_v0  ;;  %v930_v49 = vsel %vm928_vm4, %v3910_v45, %v3911_v44  ;;  %v1104_v63 = vsel %vm1102_vm5, %v3920_v54, %v3921_v53  ;;  %v931_v1 = vsel %vm928_vm4, %v3911_v44, %v3915_v47  ;;  %v3700_v47 = vld [vmem:[%s4524_s4 + $0x30] sm:$0xff] }
  0x9a   : > { %v919_v51 = vpop.permute.xlu0 %918  ;;  %3680 = vmatprep.subr.msk.mxu0 %vm438_vm1, %v930_v49  ;;  %v1093_v59 = vpop.permute.xlu1 %1092 }
  0x9b   : > { %v929_v57 = vsel %vm928_vm4, %v919_v51, %v3910_v45  ;;  %v1103_v8 = vsel %vm1102_vm5, %v1093_v59, %v3920_v54 }
  0x9c   : > { %3671 = vmatmul.mubr.msk.f32.vlgmr.msra.gmra.mrb[0].mxu1 %vm434_vm3, %v415_v40 }
  0x9d   : > { %3677 = vmatpush1.msk.msra.mxu1 %vm438_vm1, %v757_v50  ;;  %905 = vmatprep.mubr.f32.mxu1 %v4056_v0 }
  0x9e   : > { %3683 = vmatprep.subr.msk.mxu1 %vm438_vm1, %v932_v52  ;;  %v3924_v58 = vpop.permute.xlu0 %3923  ;;  %v3934_v3 = vpop.permute.xlu1 %3933 }
  0x9f   : > { %v3926_v61 = vunpack.i.h.bf16 %v3924_v58  ;;  %v3925_v62 = vunpack.i.l.bf16 %v3924_v58  ;;  %v3936_v10 = vunpack.i.h.bf16 %v3934_v3  ;;  %v3935_v12 = vunpack.i.l.bf16 %v3934_v3 }
  0xa0   : > { %3675 = vmatmul.mubr.msk.f32.vlgmr.msra.gmra.mrb[0].mxu0 %vm434_vm3, %v3672_v56 }
  0xa1   : > { %3681 = vmatpush1.msk.msra.mxu0 %vm438_vm1, %v929_v57  ;;  %1008 = vmatprep.mubr.f32.mxu0 %v4056_v0  ;;  %v1106_v4 = vsel %vm1102_vm5, %v3925_v62, %v3926_v61  ;;  %v1105_v18 = vsel %vm1102_vm5, %v3921_v53, %v3925_v62  ;;  %v1280_v20 = vsel %vm1276_vm6, %v3935_v12, %v3936_v10  ;;  %v3714_v62 = vld [vmem:[%s4524_s4 + $0x40] sm:$0xff] }
  0xa2   : > { %3687 = vmatprep.subr.msk.mxu0 %vm438_vm1, %v1104_v63  ;;  %v3929_v2 = vpop.permute.xlu0 %3928  ;;  %v3939_v17 = vpop.permute.xlu1 %3938 }
  0xa3   : > { %v3931_v5 = vunpack.i.h.bf16 %v3929_v2  ;;  %v3930_v6 = vunpack.i.l.bf16 %v3929_v2  ;;  %v3941_v21 = vunpack.i.h.bf16 %v3939_v17  ;;  %v3940_v22 = vunpack.i.l.bf16 %v3939_v17 }
  0xa4   : > { %3678 = vmatmul.mubr.msk.f32.vlgmr.msra.gmra.mrb[0].mxu1 %vm434_vm3, %v3672_v56 }
  0xa5   : > { %3684 = vmatpush1.msk.msra.mxu1 %vm438_vm1, %v931_v1  ;;  %1079 = vmatprep.mubr.f32.mxu1 %v4056_v0  ;;  %v1278_v14 = vsel %vm1276_vm6, %v3930_v6, %v3931_v5  ;;  %v1452_v28 = vsel %vm1450_vm7, %v3940_v22, %v3941_v21  ;;  %v1279_v30 = vsel %vm1276_vm6, %v3931_v5, %v3935_v12 }
  0xa6   : > { %3690 = vmatprep.subr.msk.mxu1 %vm438_vm1, %v1106_v4  ;;  %v1267_v9 = vpop.permute.xlu0 %1266  ;;  %v1441_v25 = vpop.permute.xlu1 %1440 }
  0xa7   : > { %v1277_v24 = vsel %vm1276_vm6, %v1267_v9, %v3930_v6  ;;  %v1451_v36 = vsel %vm1450_vm7, %v1441_v25, %v3940_v22 }
  0xa8   : > { %3682 = vmatmul.mubr.msk.f32.vlgmr.msra.gmra.mrb[0].mxu0 %vm434_vm3, %v3679_v7 }
  0xa9   : > { %3688 = vmatpush1.msk.msra.mxu0 %vm438_vm1, %v1103_v8  ;;  %1182 = vmatprep.mubr.f32.mxu0 %v4056_v0 }
  0xaa   : > { %3694 = vmatprep.subr.msk.mxu0 %vm438_vm1, %v1278_v14  ;;  %v3944_v19 = vpop.permute.xlu0 %3943  ;;  %v3954_v31 = vpop.permute.xlu1 %3953 }
  0xab   : > { %v3946_v26 = vunpack.i.h.bf16 %v3944_v19  ;;  %v3945_v27 = vunpack.i.l.bf16 %v3944_v19  ;;  %v3956_v37 = vunpack.i.h.bf16 %v3954_v31  ;;  %v3955_v38 = vunpack.i.l.bf16 %v3954_v31 }
  0xac   : > { %3685 = vmatmul.mubr.msk.f32.vlgmr.msra.gmra.mrb[0].mxu1 %vm434_vm3, %v3679_v7  ;;  %v1969_v7 = vld [vmem:[%s4525_s5] sm:$0xff] }
  0xad   : > { %3691 = vmatpush1.msk.msra.mxu1 %vm438_vm1, %v1105_v18  ;;  %1253 = vmatprep.mubr.f32.mxu1 %v4056_v0  ;;  %v1454_v32 = vsel %vm1450_vm7, %v3945_v27, %v3946_v26  ;;  %v1453_v42 = vsel %vm1450_vm7, %v3941_v21, %v3945_v27  ;;  %v1628_v43 = vsel %vm1624_vm8, %v3955_v38, %v3956_v37  ;;  %v3727_v21 = vld [vmem:[%s4525_s5 + $0x8] sm:$0xff] }
  0xae   : > { %3697 = vmatprep.subr.msk.mxu1 %vm438_vm1, %v1280_v20  ;;  %v3949_v29 = vpop.permute.xlu0 %3948  ;;  %v3959_v41 = vpop.permute.xlu1 %3958 }
  0xaf   : > { %v3951_v33 = vunpack.i.h.bf16 %v3949_v29  ;;  %v3950_v34 = vunpack.i.l.bf16 %v3949_v29  ;;  %v3961_v44 = vunpack.i.h.bf16 %v3959_v41  ;;  %v3960_v45 = vunpack.i.l.bf16 %v3959_v41 }
  0xb0   : > { %3689 = vmatmul.mubr.msk.f32.vlgmr.msra.gmra.mrb[0].mxu0 %vm434_vm3, %v3686_v23 }
  0xb1   : > { %3695 = vmatpush1.msk.msra.mxu0 %vm438_vm1, %v1277_v24  ;;  %1356 = vmatprep.mubr.f32.mxu0 %v4056_v0  ;;  %v1626_v39 = vsel %vm1624_vm8, %v3950_v34, %v3951_v33  ;;  %v1800_v51 = vsel %vm1798_vm9, %v3960_v45, %v3961_v44  ;;  %v1627_v52 = vsel %vm1624_vm8, %v3951_v33, %v3955_v38  ;;  %v3734_v33 = vld [vmem:[%s4525_s5 + $0x10] sm:$0xff] }
  0xb2   : > { %3701 = vmatprep.subr.msk.mxu0 %vm438_vm1, %v1452_v28  ;;  %v1615_v40 = vpop.permute.xlu0 %1614  ;;  %v1789_v53 = vpop.permute.xlu1 %1788 }
  0xb3   : > { %v1625_v48 = vsel %vm1624_vm8, %v1615_v40, %v3950_v34  ;;  %v1799_v56 = vsel %vm1798_vm9, %v1789_v53, %v3960_v45  ;;  %v3741_v45 = vld [vmem:[%s4525_s5 + $0x18] sm:$0xff] }
  0xb4   : > { %3692 = vmatmul.mubr.msk.f32.vlgmr.msra.gmra.mrb[0].mxu1 %vm434_vm3, %v3686_v23 }
  0xb5   : > { %3698 = vmatpush1.msk.msra.mxu1 %vm438_vm1, %v1279_v30  ;;  %1427 = vmatprep.mubr.f32.mxu1 %v4056_v0 }
  0xb6   : > { %3704 = vmatprep.subr.msk.mxu1 %vm438_vm1, %v1454_v32  ;;  %v3964_v46 = vpop.permute.xlu0 %3963  ;;  %v3974_v59 = vpop.permute.xlu1 %3973 }
  0xb7   : > { %v3966_v49 = vunpack.i.h.bf16 %v3964_v46  ;;  %v3965_v50 = vunpack.i.l.bf16 %v3964_v46  ;;  %v3976_v1 = vunpack.i.h.bf16 %v3974_v59  ;;  %v3975_v2 = vunpack.i.l.bf16 %v3974_v59 }
  0xb8   : > { %3696 = vmatmul.mubr.msk.f32.vlgmr.msra.gmra.mrb[0].mxu0 %vm434_vm3, %v3693_v35 }
  0xb9   : > { %3702 = vmatpush1.msk.msra.mxu0 %vm438_vm1, %v1451_v36  ;;  %1530 = vmatprep.mubr.f32.mxu0 %v4056_v0  ;;  %v1802_v54 = vsel %vm1798_vm9, %v3965_v50, %v3966_v49  ;;  %v1801_v58 = vsel %vm1798_vm9, %v3961_v44, %v3965_v50  ;;  %v2143_v5 = vsel %vm429_vm0, %v3975_v2, %v3976_v1 }
  0xba   : > { %3708 = vmatprep.subr.msk.mxu0 %vm438_vm1, %v1626_v39  ;;  %v3969_v57 = vpop.permute.xlu0 %3968  ;;  %v3979_v3 = vpop.permute.xlu1 %3978 }
  0xbb   : > { %v3971_v60 = vunpack.i.h.bf16 %v3969_v57  ;;  %v3970_v61 = vunpack.i.l.bf16 %v3969_v57  ;;  %v3981_v6 = vunpack.i.h.bf16 %v3979_v3  ;;  %v3748_v57 = vld [vmem:[%s4525_s5 + $0x20] sm:$0xff] }
  0xbc   : > { %3699 = vmatmul.mubr.msk.f32.vlgmr.msra.gmra.mrb[0].mxu1 %vm434_vm3, %v3693_v35 }
  0xbd   : > { %3705 = vmatpush1.msk.msra.mxu1 %vm438_vm1, %v1453_v42  ;;  %1601 = vmatprep.mubr.f32.mxu1 %v4056_v0 }
  0xbe   : > { %3711 = vmatprep.subr.msk.mxu1 %vm438_vm1, %v1628_v43  ;;  %v2131_v63 = vpop.permute.xlu0 %2130  ;;  %v2304_v8 = vpop.permute.xlu1 %2303 }
  0xc0   : > { %3703 = vmatmul.mubr.msk.f32.vlgmr.msra.gmra.mrb[0].mxu0 %vm434_vm3, %v3700_v47 }
  0xc1   : > { %3709 = vmatpush1.msk.msra.mxu0 %vm438_vm1, %v1625_v48  ;;  %1704 = vmatprep.mubr.f32.mxu0 %v4056_v0 }
  0xc2   : > { %3715 = vmatprep.subr.msk.mxu0 %vm438_vm1, %v1800_v51  ;;  %v3984_v4 = vpop.permute.xlu0 %3983  ;;  %v3994_v17 = vpop.permute.xlu1 %3993 }
  0xc3   : > { %v3986_v9 = vunpack.i.h.bf16 %v3984_v4  ;;  %v3985_v10 = vunpack.i.l.bf16 %v3984_v4  ;;  %v3996_v24 = vunpack.i.h.bf16 %v3994_v17  ;;  %v3995_v25 = vunpack.i.l.bf16 %v3994_v17 }
  0xc4   : > { %3706 = vmatmul.mubr.msk.f32.vlgmr.msra.gmra.mrb[0].mxu1 %vm434_vm3, %v3700_v47 }
  0xc5   : > { %3712 = vmatpush1.msk.msra.mxu1 %vm438_vm1, %v1627_v52  ;;  %1775 = vmatprep.mubr.f32.mxu1 %v4056_v0  ;;  %v2316_v18 = vsel %vm754_vm2, %v3985_v10, %v3986_v9  ;;  %v2315_v28 = vsel %vm754_vm2, %v3981_v6, %v3985_v10  ;;  %v2489_v30 = vsel %vm928_vm4, %v3995_v25, %v3996_v24 }
  0xc6   : > { %3718 = vmatprep.subr.msk.mxu1 %vm438_vm1, %v1802_v54  ;;  %v3989_v14 = vpop.permute.xlu0 %3988  ;;  %v3999_v27 = vpop.permute.xlu1 %3998 }
  0xc7   : > { %v3991_v19 = vunpack.i.h.bf16 %v3989_v14  ;;  %v3990_v20 = vunpack.i.l.bf16 %v3989_v14  ;;  %v4001_v31 = vunpack.i.h.bf16 %v3999_v27  ;;  %v4000_v32 = vunpack.i.l.bf16 %v3999_v27 }
  0xc8   : > { %3710 = vmatmul.mubr.msk.f32.vlgmr.msra.gmra.mrb[0].mxu0 %vm434_vm3, %v3707_v55 }
  0xc9   : > { %3716 = vmatpush1.msk.msra.mxu0 %vm438_vm1, %v1799_v56  ;;  %1878 = vmatprep.mubr.f32.mxu0 %v4056_v0  ;;  %v2487_v26 = vsel %vm928_vm4, %v3990_v20, %v3991_v19  ;;  %v2660_v38 = vsel %vm1102_vm5, %v4000_v32, %v4001_v31  ;;  %v2488_v40 = vsel %vm928_vm4, %v3991_v19, %v3995_v25 }
  0xca   : > { %3721 = vmatprep.subr.msk.mxu0 %vm438_vm1, %v4203_v16  ;;  %v2141_v16 = vsel %vm429_vm0, %v3970_v61, %v3971_v60  ;;  %v2477_v23 = vpop.permute.xlu0 %2476  ;;  %v2650_v35 = vpop.permute.xlu1 %2649 }
  0xcb   : > { %v2486_v34 = vsel %vm928_vm4, %v2477_v23, %v3990_v20  ;;  %v2659_v46 = vsel %vm1102_vm5, %v2650_v35, %v4000_v32 }
  0xcc   : > { %3713 = vmatmul.mubr.msk.f32.vlgmr.msra.gmra.mrb[0].mxu1 %vm434_vm3, %v3707_v55 }
  0xcd   : > { %3719 = vmatpush1.msk.msra.mxu1 %vm438_vm1, %v1801_v58  ;;  %1949 = vmatprep.mubr.f32.mxu1 %v4056_v0 }
  0xce   : > { %3724 = vmatprep.subr.msk.mxu1 %vm438_vm1, %v4195_v15  ;;  %v3980_v15 = vunpack.i.l.bf16 %v3979_v3  ;;  %v4004_v29 = vpop.permute.xlu0 %4003  ;;  %v4014_v41 = vpop.permute.xlu1 %4013 }
  0xcf   : > { %v4006_v36 = vunpack.i.h.bf16 %v4004_v29  ;;  %v4005_v37 = vunpack.i.l.bf16 %v4004_v29  ;;  %v4016_v48 = vunpack.i.h.bf16 %v4014_v41  ;;  %v4015_v49 = vunpack.i.l.bf16 %v4014_v41  ;;  %v3776_v29 = vld [vmem:[%s4525_s5 + $0x40] sm:$0xff] }
  0xd0   : > { %3717 = vmatmul.mubr.msk.f32.vlgmr.msra.gmra.mrb[0].mxu0 %vm434_vm3, %v3714_v62  ;;  %v2314_v12 = vsel %vm754_vm2, %v3980_v15, %v3981_v6  ;;  %v2313_v22 = vsel %vm754_vm2, %v2304_v8, %v3980_v15 }
  0xd1   : > { %3722 = vmatpush1.msk.msra.mxu0 %vm438_vm1, %v4191_v13  ;;  %2045 = vmatprep.mubr.f32.mxu0 %v4056_v0  ;;  %v2140_v13 = vsel %vm429_vm0, %v2131_v63, %v3970_v61  ;;  %v2662_v42 = vsel %vm1102_vm5, %v4005_v37, %v4006_v36  ;;  %v2661_v52 = vsel %vm1102_vm5, %v4001_v31, %v4005_v37 }
  0xd2   : > { %3728 = vmatprep.subr.msk.mxu0 %vm438_vm1, %v2141_v16  ;;  %v4009_v39 = vpop.permute.xlu0 %4008  ;;  %v4019_v51 = vpop.permute.xlu1 %4018  ;;  %v2835_v54 = vsel %vm1276_vm6, %v4015_v49, %v4016_v48 }
  0xd3   : > { %v4011_v43 = vunpack.i.h.bf16 %v4009_v39  ;;  %v4010_v44 = vunpack.i.l.bf16 %v4009_v39  ;;  %v4021_v55 = vunpack.i.h.bf16 %v4019_v51  ;;  %v4020_v56 = vunpack.i.l.bf16 %v4019_v51 }
  0xd4   : > { %3720 = vmatmul.mubr.msk.f32.vlgmr.msra.gmra.mrb[0].mxu1 %vm434_vm3, %v3714_v62 }
  0xd5   : > { %3725 = vmatpush1.msk.msra.mxu1 %vm438_vm1, %v4187_v11  ;;  %2116 = vmatprep.mubr.f32.mxu1 %v4056_v0  ;;  %v2142_v11 = vsel %vm429_vm0, %v3971_v60, %v3975_v2  ;;  %v2833_v50 = vsel %vm1276_vm6, %v4010_v44, %v4011_v43  ;;  %v3006_v62 = vsel %vm1450_vm7, %v4020_v56, %v4021_v55 }
  0xd6   : > { %3731 = vmatprep.subr.msk.mxu1 %vm438_vm1, %v2143_v5  ;;  %v2823_v47 = vpop.permute.xlu0 %2822  ;;  %v2996_v59 = vpop.permute.xlu1 %2995  ;;  %v2834_v1 = vsel %vm1276_vm6, %v4011_v43, %v4015_v49  ;;  %v3755_v5 = vld [vmem:[%s4525_s5 + $0x28] sm:$0xff] }
  0xd7   : > { %v2832_v58 = vsel %vm1276_vm6, %v2823_v47, %v4010_v44  ;;  %v3005_v6 = vsel %vm1450_vm7, %v2996_v59, %v4020_v56 }
  0xd8   : > { %3723 = vmatmul.mubr.msk.f32.vlgmr.msra.gmra.mrb[0].mxu0 %vm434_vm3, %v1969_v7 }
  0xd9   : > { %3729 = vmatpush1.msk.msra.mxu0 %vm438_vm1, %v2140_v13  ;;  %2219 = vmatprep.mubr.f32.mxu0 %v4056_v0 }
  0xda   : > { %3735 = vmatprep.subr.msk.mxu0 %vm438_vm1, %v2314_v12  ;;  %v4024_v53 = vpop.permute.xlu0 %4023  ;;  %v4034_v2 = vpop.permute.xlu1 %4033 }
  0xdb   : > { %v4026_v60 = vunpack.i.h.bf16 %v4024_v53  ;;  %v4025_v61 = vunpack.i.l.bf16 %v4024_v53  ;;  %v4036_v15 = vunpack.i.h.bf16 %v4034_v2 }
  0xdc   : > { %3726 = vmatmul.mubr.msk.f32.vlgmr.msra.gmra.mrb[0].mxu1 %vm434_vm3, %v1969_v7  ;;  %v4035_v7 = vunpack.i.l.bf16 %v4034_v2 }
  0xdd   : > { %3732 = vmatpush1.msk.msra.mxu1 %vm438_vm1, %v2142_v11  ;;  %2290 = vmatprep.mubr.f32.mxu1 %v4056_v0  ;;  %v3008_v16 = vsel %vm1450_vm7, %v4025_v61, %v4026_v60  ;;  %v3007_v10 = vsel %vm1450_vm7, %v4021_v55, %v4025_v61 }
  0xde   : > { %3738 = vmatprep.subr.msk.mxu1 %vm438_vm1, %v2316_v18  ;;  %v4029_v63 = vpop.permute.xlu0 %4028  ;;  %v4039_v9 = vpop.permute.xlu1 %4038  ;;  %v3181_v12 = vsel %vm1624_vm8, %v4035_v7, %v4036_v15  ;;  %v3762_v18 = vld [vmem:[%s4525_s5 + $0x30] sm:$0xff] }
  0xdf   : > { %v4031_v3 = vunpack.i.h.bf16 %v4029_v63  ;;  %v4030_v4 = vunpack.i.l.bf16 %v4029_v63  ;;  %v4041_v14 = vunpack.i.h.bf16 %v4039_v9  ;;  %v4040_v11 = vunpack.i.l.bf16 %v4039_v9 }
  0xe0   : > { %3730 = vmatmul.mubr.msk.f32.vlgmr.msra.gmra.mrb[0].mxu0 %vm434_vm3, %v3727_v21 }
  0xe1   : > { %3736 = vmatpush1.msk.msra.mxu0 %vm438_vm1, %v2313_v22  ;;  %2392 = vmatprep.mubr.f32.mxu0 %v4056_v0  ;;  %v3179_v13 = vsel %vm1624_vm8, %v4030_v4, %v4031_v3  ;;  %v3352_v22 = vsel %vm1798_vm9, %v4040_v11, %v4041_v14  ;;  %v3180_v23 = vsel %vm1624_vm8, %v4031_v3, %v4035_v7 }
  0xe2   : > { %3742 = vmatprep.subr.msk.mxu0 %vm438_vm1, %v2487_v26  ;;  %v3169_v8 = vpop.permute.xlu0 %3168  ;;  %v3342_v24 = vpop.permute.xlu1 %3341  ;;  %v3769_v26 = vld [vmem:[%s4525_s5 + $0x38] sm:$0xff] }
  0xe3   : > { %v3178_v19 = vsel %vm1624_vm8, %v3169_v8, %v4030_v4  ;;  %v3351_v27 = vsel %vm1798_vm9, %v3342_v24, %v4040_v11 }
  0xe4   : > { %3733 = vmatmul.mubr.msk.f32.vlgmr.msra.gmra.mrb[0].mxu1 %vm434_vm3, %v3727_v21 }
  0xe5   : > { %3739 = vmatpush1.msk.msra.mxu1 %vm438_vm1, %v2315_v28  ;;  %2463 = vmatprep.mubr.f32.mxu1 %v4056_v0 }
  0xe6   : > { %3745 = vmatprep.subr.msk.mxu1 %vm438_vm1, %v2489_v30  ;;  %v4044_v17 = vpop.permute.xlu0 %4043 }
  0xe7   : > { %v4046_v20 = vunpack.i.h.bf16 %v4044_v17  ;;  %v4045_v21 = vunpack.i.l.bf16 %v4044_v17 }
  0xe8   : > { %3737 = vmatmul.mubr.msk.f32.vlgmr.msra.gmra.mrb[0].mxu0 %vm434_vm3, %v3734_v33 }
  0xe9   : > { %3743 = vmatpush1.msk.msra.mxu0 %vm438_vm1, %v2486_v34  ;;  %2565 = vmatprep.mubr.f32.mxu0 %v4056_v0  ;;  %v3354_v25 = vsel %vm1798_vm9, %v4045_v21, %v4046_v20  ;;  %v3353_v28 = vsel %vm1798_vm9, %v4041_v14, %v4045_v21 }
  0xea   : > { %3749 = vmatprep.subr.msk.mxu0 %vm438_vm1, %v2660_v38 }
  0xec   : > { %3740 = vmatmul.mubr.msk.f32.vlgmr.msra.gmra.mrb[0].mxu1 %vm434_vm3, %v3734_v33 }
  0xed   : > { %3746 = vmatpush1.msk.msra.mxu1 %vm438_vm1, %v2488_v40  ;;  %2636 = vmatprep.mubr.f32.mxu1 %v4056_v0 }
  0xee   : > { %3752 = vmatprep.subr.msk.mxu1 %vm438_vm1, %v2662_v42 }
  0xf0   : > { %3744 = vmatmul.mubr.msk.f32.vlgmr.msra.gmra.mrb[0].mxu0 %vm434_vm3, %v3741_v45 }
  0xf1   : > { %3750 = vmatpush1.msk.msra.mxu0 %vm438_vm1, %v2659_v46  ;;  %2738 = vmatprep.mubr.f32.mxu0 %v4056_v0 }
  0xf2   : > { %3756 = vmatprep.subr.msk.mxu0 %vm438_vm1, %v2833_v50 }
  0xf4   : > { %3747 = vmatmul.mubr.msk.f32.vlgmr.msra.gmra.mrb[0].mxu1 %vm434_vm3, %v3741_v45 }
  0xf5   : > { %3753 = vmatpush1.msk.msra.mxu1 %vm438_vm1, %v2661_v52  ;;  %2809 = vmatprep.mubr.f32.mxu1 %v4056_v0 }
  0xf6   : > { %3759 = vmatprep.subr.msk.mxu1 %vm438_vm1, %v2835_v54 }
  0xf7   : > { %v3516_v30 = vpop.permute.xlu0 %3515 }
  0xf8   : > { %3751 = vmatmul.mubr.msk.f32.vlgmr.msra.gmra.mrb[0].mxu0 %vm434_vm3, %v3748_v57 }
  0xf9   : > { %3757 = vmatpush1.msk.msra.mxu0 %vm438_vm1, %v2832_v58  ;;  %2911 = vmatprep.mubr.f32.mxu0 %v4056_v0 }
  0xfa   : > { %3763 = vmatprep.subr.msk.mxu0 %vm438_vm1, %v3006_v62 }
  0xfc   : > { %3754 = vmatmul.mubr.msk.f32.vlgmr.msra.gmra.mrb[0].mxu1 %vm434_vm3, %v3748_v57 }
  0xfd   : > { %3760 = vmatpush1.msk.msra.mxu1 %vm438_vm1, %v2834_v1  ;;  %2982 = vmatprep.mubr.f32.mxu1 %v4056_v0 }
  0xfe   : > { %3766 = vmatprep.subr.msk.mxu1 %vm438_vm1, %v3008_v16 }
 0x100   : > { %3758 = vmatmul.mubr.msk.f32.vlgmr.msra.gmra.mrb[0].mxu0 %vm434_vm3, %v3755_v5 }
 0x101   : > { %3764 = vmatpush1.msk.msra.mxu0 %vm438_vm1, %v3005_v6  ;;  %3084 = vmatprep.mubr.f32.mxu0 %v4056_v0 }
 0x102   : > { %3770 = vmatprep.subr.msk.mxu0 %vm438_vm1, %v3179_v13 }
 0x104   : > { %3761 = vmatmul.mubr.msk.f32.vlgmr.msra.gmra.mrb[0].mxu1 %vm434_vm3, %v3755_v5 }
 0x105   : > { %3767 = vmatpush1.msk.msra.mxu1 %vm438_vm1, %v3007_v10  ;;  %3155 = vmatprep.mubr.f32.mxu1 %v4056_v0 }
 0x106   : > { %3773 = vmatprep.subr.msk.mxu1 %vm438_vm1, %v3181_v12 }
 0x108   : > { %3765 = vmatmul.mubr.msk.f32.vlgmr.msra.gmra.mrb[0].mxu0 %vm434_vm3, %v3762_v18 }
 0x109   : > { %3771 = vmatpush1.msk.msra.mxu0 %vm438_vm1, %v3178_v19  ;;  %3257 = vmatprep.mubr.f32.mxu0 %v4056_v0 }
 0x10a   : > { %3777 = vmatprep.subr.msk.mxu0 %vm438_vm1, %v3352_v22 }
 0x10c   : > { %3768 = vmatmul.mubr.msk.f32.vlgmr.msra.gmra.mrb[0].mxu1 %vm434_vm3, %v3762_v18 }
 0x10d   : > { %3774 = vmatpush1.msk.msra.mxu1 %vm438_vm1, %v3180_v23  ;;  %3328 = vmatprep.mubr.f32.mxu1 %v4056_v0 }
 0x10e   : > { %3780 = vmatprep.subr.msk.mxu1 %vm438_vm1, %v3354_v25 }
 0x110   : > { %3772 = vmatmul.mubr.msk.f32.vlgmr.msra.gmra.mrb[0].mxu0 %vm434_vm3, %v3769_v26 }
 0x111   : > { %3778 = vmatpush1.msk.msra.mxu0 %vm438_vm1, %v3351_v27  ;;  %3430 = vmatprep.mubr.f32.mxu0 %v4056_v0 }
 0x114   : > { %3775 = vmatmul.mubr.msk.f32.vlgmr.msra.gmra.mrb[0].mxu1 %vm434_vm3, %v3769_v26 }
 0x115   : > { %3781 = vmatpush1.msk.msra.mxu1 %vm438_vm1, %v3353_v28  ;;  %3501 = vmatprep.mubr.f32.mxu1 %v4056_v0 }
 0x118   : > { %3779 = vmatmul.mubr.msk.f32.vlgmr.msra.gmra.mrb[0].mxu0 %vm434_vm3, %v3776_v29 }
 0x11c   : > { %3782 = vmatmul.mubr.msk.f32.vlgmr.msra.gmra.mrb[0].mxu1 %vm434_vm3, %v3776_v29 }
 0x1eb   : > { %v3432_v31 = vpop.f32.mrb[0].mxu0 }
 0x1ec   : > { %v3518_v32 = vadd.f32 %v3516_v30, %v3432_v31  ;;  %v3434_v33 = vpop.f32.mrb[1].mxu0 }
 0x1ed   : > { %v3519_v34 = vadd.f32 %v3516_v30, %v3434_v33 }
 0x1ee   : > { %v3522_v35 = vmul.f32 0.1, %v3518_v32 }
 0x1ef   : > { %v3523_v36 = vmul.f32 0.1, %v3519_v34  ;;  %v3503_v37 = vpop.f32.mrb[0].mxu1 }
 0x1f0   : > { %v3526_v38 = vmax.f32 %v3518_v32, %v3522_v35  ;;  %v3520_v39 = vadd.f32 %v3516_v30, %v3503_v37  ;;  %v3505_v40 = vpop.f32.mrb[1].mxu1 }
 0x1f1   : > { %v3527_v41 = vmax.f32 %v3519_v34, %v3523_v36  ;;  %v3521_v0 = vadd.f32 %v3516_v30, %v3505_v40 }
 0x1f2   : > { %v3524_v42 = vmul.f32 0.1, %v3520_v39 }
 0x1f3   : > { %v3799_v43 = vpack.c.bf16 %v3527_v41, %v3526_v38  ;;  %v3525_v44 = vmul.f32 0.1, %v3521_v0 }
 0x1f4   : > { %v3528_v45 = vmax.f32 %v3520_v39, %v3524_v42 }
 0x1f5   : > { %3546 = vst [vmem:[%s404_s28] sm:$0xff] %v3799_v43  ;;  %v3529_v46 = vmax.f32 %v3521_v0, %v3525_v44 }
 0x1f7   : > { %v3800_v47 = vpack.c.bf16 %v3529_v46, %v3528_v45 }
 0x1f9   : > { %3547 = vst [vmem:[%s404_s28 + $0x8] sm:$0xff] %v3800_v47 }
 0x1fa PF: > { %s17_s24 = sadd.s32 1, %s4054_s24  }
 0x1fb   : > { %p14_p6 = scmp.ge.s32.totalorder %s17_s24, 7  }
 0x1fd   :  { %16 = sbr.rel (!%p14_p6) target bundleno = 1 (0x1), region = 103 }

// kernel: up_forward.5
= control target key start
LH: loop header
LB: loop body
LE: loop exit
PB: predicated region body
PF: predicated region fallthrough
CT: control target
= control target key end

     0   :  { %s2079_s15 = smov 0   ;;  %s2235_s0 = inlined_call_operand.vmem [shape: bf16[8,2688], index: 0, kind: input, shape index: {}, may-alias: {0,1}]   ;;  %s2236_s1 = inlined_call_operand.vmem [shape: bf16[8,2688], index: 1, kind: input, shape index: {}, may-alias: {0,1}]   ;;  %s2237_s2 = inlined_call_operand.vmem [shape: f32[9,8,8], index: 2, kind: input, shape index: {}]   ;;  %s2238_s3 = inlined_call_operand.vmem [shape: f32[8,1], index: 3, kind: input, shape index: {}]   ;;  %s2239_s4 = inlined_call_operand.vmem [shape: f32[8,2560], index: 4, kind: output, shape index: {}]  }
   0x1 LB: > { %s1858_s16 = sadd.s32 4294967295, %s2042_s15   ;;  %p1864_p0 = scmp.ge.s32.totalorder %s2042_s15, 1  ;;  %s2042_s15 = sphi %s2079_s15, %s14_s15  }
   0x2   : > { %p188_p1 = scmp.lt.s32.totalorder %s2042_s15, 6 }
   0x4   : > { %p189_p2 = pnand %p1864_p0, %p188_p1 }
   0x5   : > { %s2087_s17 = sshll.u32 (!%p189_p2), %s1858_s16, 2  ;;  %v2044_v0 = vmov (!%p189_p2), 0.0   ;;  %s2045_s28 = smov (!%p189_p2), 127   ;;  %v1768_v11 = vld [vmem:[%s2238_s3] sm:$0xff] (!%p189_p2)  ;;  %v2053_v12 = vmov (!%p189_p2), 0   ;;  %vm278_vm0 = vcmask (!%p189_p2), 1039360  }
   0x6   : > { %192 = sbr.rel (%p189_p2) target bundleno = 430 (0x1ae), region = 36  ;;  %p229_p3 = scmp.lt.s32.totalorder (!%p189_p2), %s2087_s17, 20  ;;  %355 = vmatprep.mubr.f32.mxu0 (!%p189_p2), %v2044_v0  ;;  %426 = vmatprep.mubr.f32.mxu1 (!%p189_p2), %v2044_v0  ;;  %vm287_vm1 = vcmask (!%p189_p2), 64512   ;;  %vm590_vm2 = vcmask (!%p189_p2), 1031168   ;;  %v1871_v20 = vld [vmem:[%s2237_s2 + $0x8] sm:$0xff] (!%p189_p2)  ;;  %v260_v34 = vld [vmem:[%s2237_s2] sm:$0xff] (!%p189_p2) }
   0x7   : > { %s1904_s18 = sadd.s32 (!%p189_p2), 4, %s2087_s17  ;;  %s2046_s29 = smov (!%p189_p2), 126   ;;  %2035 = vset.pattern.permute.xlu0 (!%p189_p2), %v2053_v12  ;;  %vm760_vm3 = vcmask (!%p189_p2), 769024   ;;  %vm930_vm4 = vcmask (!%p189_p2), 760832   ;;  %v1876_v49 = vld [vmem:[%s2237_s2 + $0x10] sm:$0xff] (!%p189_p2)  ;;  %vm1100_vm5 = vcmask (!%p189_p2), 752640  }
   0x8   : > { %p240_p4 = scmp.lt.s32.totalorder (!%p189_p2), %s1904_s18, 20  ;;  %s2047_s30 = smov (!%p189_p2), 94   ;;  %v1879_v62 = vld [vmem:[%s2237_s2 + $0x18] sm:$0xff] (!%p189_p2)  ;;  %vm1270_vm6 = vcmask (!%p189_p2), 490496   ;;  %vm1440_vm7 = vcmask (!%p189_p2), 482304   ;;  %vm1610_vm8 = vcmask (!%p189_p2), 474112  }
   0x9   : > { %s2048_s5 = smov (!%p189_p2), 93   ;;  %s2049_s6 = smov (!%p189_p2), 92  }
   0xa   : > { %s2050_s7 = smov (!%p189_p2), 60   ;;  %s2051_s8 = smov (!%p189_p2), 59  }
   0xb   : > { %s2052_s9 = smov (!%p189_p2), 58   ;;  %p247_p5 = scmp.lt.s32.totalorder (!%p189_p2), %s2087_s17, 19 }
   0xd   : > { %s230_s19 = scalar_select %p229_p3, %s2087_s17, 20 }
   0xe   : > { %s2241_s18 = smov (!%p240_p4, %s1904_s18), 20  ;;  %s2243_s17 = smov (!%p247_p5, %s2087_s17), 19 }
   0xf   : > { %s1866_s20 = sshll.u32 %s230_s19, 2  ;;  %s1868_s24 = sshll.u32 %s2241_s18, 2 }
  0x10   : > { %s232_s23 = scalar_lea.vmem %s2235_s0, %s1866_s20  ;;  %s243_s27 = scalar_lea.vmem %s2236_s1, %s1868_s24 }
  0x11   : > { %v2097_v1 = vld [vmem:[%s232_s23] sm:$0xff]  ;;  %v2099_v2 = vld [vmem:[%s232_s23 + $0x8] sm:$0xff] }
  0x12   : > { %v255_v3 = vunpack.c.h.bf16 %v2097_v1  ;;  %v256_v4 = vunpack.c.l.bf16 %v2099_v2  ;;  %v257_v5 = vunpack.c.h.bf16 %v2099_v2  ;;  %v2108_v6 = vunpack.c.l.bf16 %v2097_v1  ;;  %v258_v7 = vld [vmem:[%s243_s27] sm:$0xf] }
  0x13   : > { %v259_v8 = vunpack.c.l.bf16 %v258_v7 }
  0x14   : > { %v1955_v9 = vpack.i.bf16 %v256_v4, %v255_v3  ;;  %268 = vrot.lane.b32.xlu1 %v2108_v6, %s2045_s28 }
  0x15   : > { %v1960_v10 = vpack.i.bf16 %v259_v8, %v257_v5 }
  0x16   : > { %1956 = vrot.lane.b32.xlu0 %v1955_v9, %s2045_s28 }
  0x18   : > { %1966 = vrot.lane.b32.xlu1 %v1955_v9, %s2046_s29 }
  0x1a   : > { %1961 = vrot.lane.b32.xlu0 %v1960_v10, %s2045_s28 }
  0x1c   : > { %580 = vrot.lane.b32.xlu1 %v2108_v6, %s2046_s29 }
  0x1e   : > { %1971 = vrot.lane.b32.xlu0 %v1960_v10, %s2046_s29 }
  0x20   : > { %1981 = vrot.lane.b32.xlu1 %v1960_v10, %s2047_s30 }
  0x22   : > { %1976 = vrot.lane.b32.xlu0 %v1955_v9, %s2047_s30 }
  0x24   : > { %1986 = vrot.lane.b32.xlu1 %v1955_v9, %s2048_s5 }
  0x26   : > { %750 = vrot.lane.b32.xlu0 %v2108_v6, %s2047_s30 }
  0x28   : > { %920 = vrot.lane.b32.xlu1 %v2108_v6, %s2048_s5 }
  0x2a   : > { %1991 = vrot.lane.b32.xlu0 %v1960_v10, %s2048_s5 }
  0x2c   : > { %2001 = vrot.lane.b32.xlu1 %v1960_v10, %s2049_s6 }
  0x2e   : > { %1996 = vrot.lane.b32.xlu0 %v1955_v9, %s2049_s6 }
  0x30   : > { %2006 = vrot.lane.b32.xlu1 %v1955_v9, %s2050_s7 }
  0x32   : > { %1090 = vrot.lane.b32.xlu0 %v2108_v6, %s2049_s6  ;;  %s1870_s6 = sshll.u32 %s2243_s17, 3 }
  0x34   : > { %1260 = vrot.lane.b32.xlu1 %v2108_v6, %s2050_s7 }
  0x36   : > { %2011 = vrot.lane.b32.xlu0 %v1960_v10, %s2050_s7 }
  0x38   : > { %2021 = vrot.lane.b32.xlu1 %v1960_v10, %s2051_s8 }
  0x3a   : > { %2016 = vrot.lane.b32.xlu0 %v1955_v9, %s2051_s8 }
  0x3c   : > { %2026 = vrot.lane.b32.xlu1 %v1955_v9, %s2052_s9 }
  0x3e   : > { %1430 = vrot.lane.b32.xlu0 %v2108_v6, %s2051_s8 }
  0x40   : > { %1600 = vrot.lane.b32.xlu1 %v2108_v6, %s2052_s9 }
  0x42   : > { %2031 = vrot.lane.b32.xlu0 %v1960_v10, %s2052_s9  ;;  %s250_s9 = scalar_lea.vmem %s2239_s4, %s1870_s6 }
  0x46   : > { %1771 = vperm.xlu0 %2035, %v1768_v11   ;;  %v1882_v11 = vld [vmem:[%s2237_s2 + $0x20] sm:$0xff] }
  0x86   : > { %v269_v13 = vpop.permute.xlu1 %268 }
  0x88   : > { %v1957_v14 = vpop.permute.xlu0 %1956 }
  0x89   : > { %v1959_v15 = vunpack.i.h.bf16 %v1957_v14  ;;  %v1958_v16 = vunpack.i.l.bf16 %v1957_v14 }
  0x8a   : > { %v1967_v17 = vpop.permute.xlu1 %1966 }
  0x8b   : > { %v280_v18 = vsel %vm278_vm0, %v1958_v16, %v1959_v15  ;;  %v279_v19 = vsel %vm278_vm0, %v269_v13, %v1958_v16  ;;  %v1969_v21 = vunpack.i.h.bf16 %v1967_v17  ;;  %v1968_v22 = vunpack.i.l.bf16 %v1967_v17 }
  0x8c   : > { %v1962_v23 = vpop.permute.xlu0 %1961  ;;  %291 = vmatprep.subr.mxu0 %v280_v18 }
  0x8d   : > { %v1964_v24 = vunpack.i.h.bf16 %v1962_v23  ;;  %v1963_v25 = vunpack.i.l.bf16 %v1962_v23  ;;  %292 = vmatpush1.msra.mxu0 %v279_v19  ;;  %v592_v26 = vsel %vm590_vm2, %v1968_v22, %v1969_v21  ;;  %v1885_v23 = vld [vmem:[%s2237_s2 + $0x28] sm:$0xff] }
  0x8e   : > { %1872 = vmatmul.mubr.msk.f32.vlgmr.msra.gmra.mrb[0].mxu0 %vm287_vm1, %v1871_v20  ;;  %436 = vmatprep.subr.mxu0 %v255_v3  ;;  %v581_v27 = vpop.permute.xlu1 %580 }
  0x8f   : > { %v282_v28 = vsel %vm278_vm0, %v1963_v25, %v1964_v24  ;;  %v281_v29 = vsel %vm278_vm0, %v1959_v15, %v1963_v25  ;;  %437 = vmatpush1.msra.mxu0 %v2108_v6  ;;  %500 = vmatprep.mubr.f32.mxu0 %v2044_v0  ;;  %v591_v36 = vsel %vm590_vm2, %v581_v27, %v1968_v22 }
  0x90   : > { %362 = vmatprep.subr.mxu1 %v282_v28  ;;  %v1972_v30 = vpop.permute.xlu0 %1971  ;;  %602 = vmatprep.subr.mxu0 %v592_v26 }
  0x91   : > { %363 = vmatpush1.msra.mxu1 %v281_v29  ;;  %v1974_v31 = vunpack.i.h.bf16 %v1972_v30  ;;  %v1973_v32 = vunpack.i.l.bf16 %v1972_v30 }
  0x92   : > { %1873 = vmatmul.mubr.msk.f32.vlgmr.msra.gmra.mrb[0].mxu1 %vm287_vm1, %v1871_v20  ;;  %507 = vmatprep.subr.mxu1 %v257_v5  ;;  %v1982_v33 = vpop.permute.xlu1 %1981 }
  0x93   : > { %508 = vmatpush1.msra.mxu1 %v256_v4  ;;  %571 = vmatprep.mubr.f32.mxu1 %v2044_v0  ;;  %v594_v35 = vsel %vm590_vm2, %v1973_v32, %v1974_v31  ;;  %v1984_v40 = vunpack.i.h.bf16 %v1982_v33  ;;  %v1983_v41 = vunpack.i.l.bf16 %v1982_v33  ;;  %v593_v44 = vsel %vm590_vm2, %v1969_v21, %v1973_v32 }
  0x94   : > { %673 = vmatprep.subr.mxu1 %v594_v35  ;;  %v1977_v37 = vpop.permute.xlu0 %1976  ;;  %v1888_v35 = vld [vmem:[%s2237_s2 + $0x30] sm:$0xff] }
  0x95   : > { %v1979_v38 = vunpack.i.h.bf16 %v1977_v37  ;;  %v1978_v39 = vunpack.i.l.bf16 %v1977_v37  ;;  %v764_v46 = vsel %vm760_vm3, %v1983_v41, %v1984_v40 }
  0x96   : > { %1874 = vmatmul.mubr.msk.f32.vlgmr.msra.gmra.mrb[0].mxu0 %vm287_vm1, %v260_v34  ;;  %v1987_v42 = vpop.permute.xlu1 %1986 }
  0x97   : > { %603 = vmatpush1.msra.mxu0 %v591_v36  ;;  %666 = vmatprep.mubr.f32.mxu0 %v2044_v0  ;;  %v762_v43 = vsel %vm760_vm3, %v1978_v39, %v1979_v38  ;;  %v1989_v47 = vunpack.i.h.bf16 %v1987_v42  ;;  %v1988_v48 = vunpack.i.l.bf16 %v1987_v42  ;;  %v763_v56 = vsel %vm760_vm3, %v1979_v38, %v1983_v41 }
  0x98   : > { %v751_v45 = vpop.permute.xlu0 %750  ;;  %772 = vmatprep.subr.mxu0 %v762_v43  ;;  %v1891_v43 = vld [vmem:[%s2237_s2 + $0x38] sm:$0xff] }
  0x99   : > { %v761_v50 = vsel %vm760_vm3, %v751_v45, %v1978_v39  ;;  %v932_v55 = vsel %vm930_vm4, %v1988_v48, %v1989_v47 }
  0x9a   : > { %1875 = vmatmul.mubr.msk.f32.vlgmr.msra.gmra.mrb[0].mxu1 %vm287_vm1, %v260_v34  ;;  %v921_v52 = vpop.permute.xlu1 %920 }
  0x9b   : > { %674 = vmatpush1.msra.mxu1 %v593_v44  ;;  %737 = vmatprep.mubr.f32.mxu1 %v2044_v0  ;;  %v931_v63 = vsel %vm930_vm4, %v921_v52, %v1988_v48 }
  0x9c   : > { %843 = vmatprep.subr.mxu1 %v764_v46  ;;  %v1992_v51 = vpop.permute.xlu0 %1991  ;;  %v1894_v46 = vld [vmem:[%s2237_s2 + $0x40] sm:$0xff] }
  0x9d   : > { %v1994_v53 = vunpack.i.h.bf16 %v1992_v51  ;;  %v1993_v54 = vunpack.i.l.bf16 %v1992_v51 }
  0x9e   : > { %1877 = vmatmul.mubr.msk.f32.vlgmr.msra.gmra.mrb[0].mxu0 %vm287_vm1, %v1876_v49  ;;  %v2002_v58 = vpop.permute.xlu1 %2001 }
  0x9f   : > { %773 = vmatpush1.msra.mxu0 %v761_v50  ;;  %836 = vmatprep.mubr.f32.mxu0 %v2044_v0  ;;  %v934_v59 = vsel %vm930_vm4, %v1993_v54, %v1994_v53  ;;  %v2004_v2 = vunpack.i.h.bf16 %v2002_v58  ;;  %v2003_v3 = vunpack.i.l.bf16 %v2002_v58  ;;  %v933_v6 = vsel %vm930_vm4, %v1989_v47, %v1993_v54 }
  0xa0   : > { %942 = vmatprep.subr.mxu0 %v932_v55  ;;  %v1997_v57 = vpop.permute.xlu0 %1996 }
  0xa1   : > { %v1999_v60 = vunpack.i.h.bf16 %v1997_v57  ;;  %v1998_v61 = vunpack.i.l.bf16 %v1997_v57  ;;  %v1104_v8 = vsel %vm1100_vm5, %v2003_v3, %v2004_v2 }
  0xa2   : > { %1878 = vmatmul.mubr.msk.f32.vlgmr.msra.gmra.mrb[0].mxu1 %vm287_vm1, %v1876_v49  ;;  %v2007_v5 = vpop.permute.xlu1 %2006 }
  0xa3   : > { %844 = vmatpush1.msra.mxu1 %v763_v56  ;;  %907 = vmatprep.mubr.f32.mxu1 %v2044_v0  ;;  %v1102_v4 = vsel %vm1100_vm5, %v1998_v61, %v1999_v60  ;;  %v2009_v9 = vunpack.i.h.bf16 %v2007_v5  ;;  %v2008_v10 = vunpack.i.l.bf16 %v2007_v5  ;;  %v1103_v18 = vsel %vm1100_vm5, %v1999_v60, %v2003_v3 }
  0xa4   : > { %1013 = vmatprep.subr.mxu1 %v934_v59  ;;  %v1091_v1 = vpop.permute.xlu0 %1090 }
  0xa5   : > { %v1101_v12 = vsel %vm1100_vm5, %v1091_v1, %v1998_v61  ;;  %v1272_v16 = vsel %vm1270_vm6, %v2008_v10, %v2009_v9 }
  0xa6   : > { %1880 = vmatmul.mubr.msk.f32.vlgmr.msra.gmra.mrb[0].mxu0 %vm287_vm1, %v1879_v62  ;;  %v1261_v13 = vpop.permute.xlu1 %1260 }
  0xa7   : > { %943 = vmatpush1.msra.mxu0 %v931_v63  ;;  %1006 = vmatprep.mubr.f32.mxu0 %v2044_v0  ;;  %v1271_v24 = vsel %vm1270_vm6, %v1261_v13, %v2008_v10 }
  0xa8   : > { %1112 = vmatprep.subr.mxu0 %v1102_v4  ;;  %v2012_v7 = vpop.permute.xlu0 %2011 }
  0xa9   : > { %v2014_v14 = vunpack.i.h.bf16 %v2012_v7  ;;  %v2013_v15 = vunpack.i.l.bf16 %v2012_v7 }
  0xaa   : > { %1881 = vmatmul.mubr.msk.f32.vlgmr.msra.gmra.mrb[0].mxu1 %vm287_vm1, %v1879_v62  ;;  %v2022_v19 = vpop.permute.xlu1 %2021 }
  0xab   : > { %1014 = vmatpush1.msra.mxu1 %v933_v6  ;;  %1077 = vmatprep.mubr.f32.mxu1 %v2044_v0  ;;  %v1274_v20 = vsel %vm1270_vm6, %v2013_v15, %v2014_v14  ;;  %v2024_v25 = vunpack.i.h.bf16 %v2022_v19  ;;  %v2023_v26 = vunpack.i.l.bf16 %v2022_v19  ;;  %v1273_v30 = vsel %vm1270_vm6, %v2009_v9, %v2013_v15 }
  0xac   : > { %1183 = vmatprep.subr.mxu1 %v1104_v8  ;;  %v2017_v17 = vpop.permute.xlu0 %2016 }
  0xad   : > { %v2019_v21 = vunpack.i.h.bf16 %v2017_v17  ;;  %v2018_v22 = vunpack.i.l.bf16 %v2017_v17  ;;  %v1444_v31 = vsel %vm1440_vm7, %v2023_v26, %v2024_v25 }
  0xae   : > { %1883 = vmatmul.mubr.msk.f32.vlgmr.msra.gmra.mrb[0].mxu0 %vm287_vm1, %v1882_v11  ;;  %v2027_v29 = vpop.permute.xlu1 %2026 }
  0xaf   : > { %1113 = vmatpush1.msra.mxu0 %v1101_v12  ;;  %1176 = vmatprep.mubr.f32.mxu0 %v2044_v0  ;;  %v1442_v27 = vsel %vm1440_vm7, %v2018_v22, %v2019_v21  ;;  %v2029_v32 = vunpack.i.h.bf16 %v2027_v29  ;;  %v2028_v33 = vunpack.i.l.bf16 %v2027_v29  ;;  %v1443_v40 = vsel %vm1440_vm7, %v2019_v21, %v2023_v26 }
  0xb0   : > { %1282 = vmatprep.subr.mxu0 %v1272_v16  ;;  %v1431_v28 = vpop.permute.xlu0 %1430 }
  0xb1   : > { %v1441_v36 = vsel %vm1440_vm7, %v1431_v28, %v2018_v22  ;;  %v1612_v39 = vsel %vm1610_vm8, %v2028_v33, %v2029_v32 }
  0xb2   : > { %1884 = vmatmul.mubr.msk.f32.vlgmr.msra.gmra.mrb[0].mxu1 %vm287_vm1, %v1882_v11  ;;  %v1601_v41 = vpop.permute.xlu1 %1600 }
  0xb3   : > { %1184 = vmatpush1.msra.mxu1 %v1103_v18  ;;  %1247 = vmatprep.mubr.f32.mxu1 %v2044_v0  ;;  %v1611_v44 = vsel %vm1610_vm8, %v1601_v41, %v2028_v33 }
  0xb4   : > { %1353 = vmatprep.subr.mxu1 %v1274_v20  ;;  %v2032_v34 = vpop.permute.xlu0 %2031 }
  0xb5   : > { %v2034_v37 = vunpack.i.h.bf16 %v2032_v34  ;;  %v2033_v38 = vunpack.i.l.bf16 %v2032_v34 }
  0xb6   : > { %1886 = vmatmul.mubr.msk.f32.vlgmr.msra.gmra.mrb[0].mxu0 %vm287_vm1, %v1885_v23 }
  0xb7   : > { %1283 = vmatpush1.msra.mxu0 %v1271_v24  ;;  %1346 = vmatprep.mubr.f32.mxu0 %v2044_v0  ;;  %v1614_v42 = vsel %vm1610_vm8, %v2033_v38, %v2034_v37  ;;  %v1613_v45 = vsel %vm1610_vm8, %v2029_v32, %v2033_v38 }
  0xb8   : > { %1452 = vmatprep.subr.mxu0 %v1442_v27 }
  0xba   : > { %1887 = vmatmul.mubr.msk.f32.vlgmr.msra.gmra.mrb[0].mxu1 %vm287_vm1, %v1885_v23 }
  0xbb   : > { %1354 = vmatpush1.msra.mxu1 %v1273_v30  ;;  %1417 = vmatprep.mubr.f32.mxu1 %v2044_v0 }
  0xbc   : > { %1523 = vmatprep.subr.mxu1 %v1444_v31 }
  0xbe   : > { %1889 = vmatmul.mubr.msk.f32.vlgmr.msra.gmra.mrb[0].mxu0 %vm287_vm1, %v1888_v35 }
  0xbf   : > { %1453 = vmatpush1.msra.mxu0 %v1441_v36  ;;  %1516 = vmatprep.mubr.f32.mxu0 %v2044_v0 }
  0xc0   : > { %1622 = vmatprep.subr.mxu0 %v1612_v39 }
  0xc2   : > { %1890 = vmatmul.mubr.msk.f32.vlgmr.msra.gmra.mrb[0].mxu1 %vm287_vm1, %v1888_v35 }
  0xc3   : > { %1524 = vmatpush1.msra.mxu1 %v1443_v40  ;;  %1587 = vmatprep.mubr.f32.mxu1 %v2044_v0 }
  0xc4   : > { %1693 = vmatprep.subr.mxu1 %v1614_v42 }
  0xc5   : > { %v1772_v47 = vpop.permute.xlu0 %1771 }
  0xc6   : > { %1892 = vmatmul.mubr.msk.f32.vlgmr.msra.gmra.mrb[0].mxu0 %vm287_vm1, %v1891_v43 }
  0xc7   : > { %1623 = vmatpush1.msra.mxu0 %v1611_v44  ;;  %1686 = vmatprep.mubr.f32.mxu0 %v2044_v0 }
  0xca   : > { %1893 = vmatmul.mubr.msk.f32.vlgmr.msra.gmra.mrb[0].mxu1 %vm287_vm1, %v1891_v43 }
  0xcb   : > { %1694 = vmatpush1.msra.mxu1 %v1613_v45  ;;  %1757 = vmatprep.mubr.f32.mxu1 %v2044_v0 }
  0xce   : > { %1895 = vmatmul.mubr.msk.f32.vlgmr.msra.gmra.mrb[0].mxu0 %vm287_vm1, %v1894_v46 }
  0xd2   : > { %1896 = vmatmul.mubr.msk.f32.vlgmr.msra.gmra.mrb[0].mxu1 %vm287_vm1, %v1894_v46 }
 0x1a1   : > { %v1688_v48 = vpop.f32.mrb[0].mxu0 }
 0x1a2   : > { %v1774_v49 = vadd.f32 %v1772_v47, %v1688_v48  ;;  %v1690_v50 = vpop.f32.mrb[1].mxu0 }
 0x1a3   : > { %v1775_v51 = vadd.f32 %v1772_v47, %v1690_v50 }
 0x1a4   : > { %v1778_v52 = vmul.f32 0.1, %v1774_v49 }
 0x1a5   : > { %v1779_v53 = vmul.f32 0.1, %v1775_v51  ;;  %v1759_v54 = vpop.f32.mrb[0].mxu1 }
 0x1a6   : > { %v1782_v0 = vmax.f32 %v1774_v49, %v1778_v52  ;;  %v1776_v55 = vadd.f32 %v1772_v47, %v1759_v54  ;;  %v1761_v56 = vpop.f32.mrb[1].mxu1 }
 0x1a7   : > { %v1783_v57 = vmax.f32 %v1775_v51, %v1779_v53  ;;  %v1777_v58 = vadd.f32 %v1772_v47, %v1761_v56 }
 0x1a8   : > { %1786 = vst [vmem:[%s250_s9] sm:$0xff] %v1782_v0  ;;  %v1780_v59 = vmul.f32 0.1, %v1776_v55 }
 0x1a9   : > { %1787 = vst [vmem:[%s250_s9 + $0x8] sm:$0xff] %v1783_v57  ;;  %v1781_v60 = vmul.f32 0.1, %v1777_v58 }
 0x1aa   : > { %v1784_v61 = vmax.f32 %v1776_v55, %v1780_v59 }
 0x1ab   : > { %v1785_v62 = vmax.f32 %v1777_v58, %v1781_v60 }
 0x1ac   : > { %1788 = vst [vmem:[%s250_s9 + $0x10] sm:$0xff] %v1784_v61 }
 0x1ad   : > { %1789 = vst [vmem:[%s250_s9 + $0x18] sm:$0xff] %v1785_v62 }
 0x1ae PF: > { %s14_s15 = sadd.s32 1, %s2042_s15  }
 0x1af   : > { %p11_p6 = scmp.ge.s32.totalorder %s14_s15, 7  }
 0x1b1   :  { %13 = sbr.rel (!%p11_p6) target bundleno = 1 (0x1), region = 77 }

</bundles_post_ra>
